<compile_context>
chip_gen: v7x
topology: tpu7x:2x2x1
jax: 0.10.0
libtpu: 0.0.40
codegen_flags: <defaults>
</compile_context>

<pallas_src>
import functools

import jax
import jax.numpy as jnp
from jax.experimental import pallas as pl
from jax.experimental.pallas import tpu as pltpu

LOG_SIG_MAX = 2.0
LOG_SIG_MIN = -20.0

GRID_SIZE = 5        # efficient-KAN defaults
SPLINE_ORDER = 3
GRID_RANGE = (-1.0, 1.0)

NUM_COEF = GRID_SIZE + SPLINE_ORDER           # spline coefficients per input (8)
NUM_BASE0 = GRID_SIZE + 2 * SPLINE_ORDER      # degree-0 bases per input (11)
_H = (GRID_RANGE[1] - GRID_RANGE[0]) / GRID_SIZE   # uniform knot spacing


def _num_fold_blocks(i_dim):
    """Lane-folded degree-0 block count for one input column.

    Smallest n >= NUM_BASE0 with (n * i_dim) % 128 == 0, so the Cox-de Boor
    neighbour shift can be a pltpu.roll on full lane tiles and the MXU K-dim
    stays lane-aligned.  The extra blocks map to zero weight rows.  Falls back
    to exactly NUM_BASE0 (with a concat-based shift) if no small n exists.
    """
    for n in range(NUM_BASE0, 2 * NUM_BASE0 + 1):
        if (n * i_dim) % 128 == 0:
            return n, True
    return NUM_BASE0, False


# ----------------------------- in-kernel helpers ---------------------------- #
def _bspline_bases(x, i_dim, n_blk, aligned):
    """Cubic B-spline bases on the uniform default grid, lane-folded.

    x: (B, I) f32.  Returns (B, n_blk*I) f32 where column c*I + i holds
    B_c(x[:, i]) for c < NUM_COEF; columns with c >= NUM_COEF carry junk that
    the fused weight's zero rows discard.
    """
    bsz = x.shape[0]
    width = n_blk * i_dim

    # One lane-tiled replica of x and ONE full-width subtract of the knot
    # field t_j = lo + (j - order)*h, built from a 2-D iota (no constant
    # table, no per-knot concatenations, no integer division).
    x_rep = jnp.concatenate([x] * n_blk, axis=1)                  # (B, width)
    col = jax.lax.broadcasted_iota(jnp.int32, (bsz, width), 1).astype(jnp.float32)
    blk = jnp.floor((col + 0.5) * (1.0 / i_dim))                  # basis block j
    xm = x_rep - ((GRID_RANGE[0] - SPLINE_ORDER * _H) + blk * _H)  # x - t_j

    # Degree 0: right-open indicator of [t_j, t_{j+1}) (as in efficient-KAN).
    bases = jnp.where((xm >= 0.0) & (xm < _H), 1.0, 0.0)

    # Cox-de Boor recursion, vectorized across the basis index.  The j+1
    # neighbour is a static lane rotation (XLU slot); wrapped values only ever
    # reach basis blocks >= NUM_COEF, whose weight rows are zero.  Uniform
    # grid -> every denominator is the compile-time constant k*h.
    for k in range(1, SPLINE_ORDER + 1):
        if aligned:
            nxt = pltpu.roll(bases, shift=width - i_dim, axis=1)   # block j+1 -> j
        else:
            nxt = jnp.concatenate(
                [bases[:, i_dim:], jnp.zeros_like(bases[:, :i_dim])], axis=1)
        bases = (xm * bases + ((k + 1) * _H - xm) * nxt) * (1.0 / (k * _H))
    return bases


def _kan_linear(x, w_bf16, i_dim, n_blk, aligned):
    """One KANLinear as a single MXU matmul: [bases | silu(x)] @ W_fused."""
    silu = x * (1.0 / (1.0 + jnp.exp(-x)))
    bases = _bspline_bases(x, i_dim, n_blk, aligned)
    op = jnp.concatenate(
        [bases.astype(jnp.bfloat16), silu.astype(jnp.bfloat16)], axis=1)
    return jnp.dot(op, w_bf16, preferred_element_type=jnp.float32)


def _policy_kernel(x_ref, w_ref, out_ref, *, layer_dims):
    """Fused KGaussianPolicy.forward: 4 KANLinear evals, one packed bf16
    weight (static sublane-aligned slices), one lane-dense (B, 2A) output
    with the log_std clamp applied via a lane mask."""
    num_actions = layer_dims[-1][1] // 2
    x = x_ref[...].astype(jnp.float32)
    k_off = 0
    for i_dim, o_dim in layer_dims:
        n_blk, aligned = _num_fold_blocks(i_dim)
        k_len = (n_blk + 1) * i_dim
        w = w_ref[k_off:k_off + k_len, :o_dim]        # bf16, static slice
        x = _kan_linear(x, w, i_dim, n_blk, aligned)
        k_off += k_len
    # columns [0, A) = mean (passthrough), [A, 2A) = log_std (clamped).
    col = jax.lax.broadcasted_iota(jnp.int32, x.shape, 1)
    out_ref[...] = jnp.where(col >= num_actions,
                             jnp.clip(x, LOG_SIG_MIN, LOG_SIG_MAX), x)


# --------------------------------- wrapper ---------------------------------- #
def k_gaussian_policy_forward(state, w_packed, *, layer_dims, batch_block=None):
    """(mean, log_std) = KGaussianPolicy.forward(state) as a single pallas_call."""
    bsz, n_in = state.shape
    num_actions = layer_dims[-1][1] // 2
    out_dim = 2 * num_actions
    kernel = functools.partial(_policy_kernel, layer_dims=layer_dims)
    out_shape = jax.ShapeDtypeStruct((bsz, out_dim), jnp.float32)

    if batch_block is None or batch_block >= bsz:
        # Small batch: no grid, everything (~100 KB) VMEM-resident, one call.
        vmem = pl.BlockSpec(memory_space=pltpu.MemorySpace.VMEM)
        out = pl.pallas_call(
            kernel, in_specs=[vmem, vmem], out_specs=vmem, out_shape=out_shape,
        )(state, w_packed)
    else:
        # Production batch: batch-parallel grid (v7x: both TensorCores; also a
        # VMEM-budget guard for v7x's 64 MiB).  The packed weight has a
        # constant index_map so it stays VMEM-resident across grid steps.
        assert bsz % batch_block == 0, "batch_block must divide the batch"
        out = pl.pallas_call(
            kernel,
            grid=(bsz // batch_block,),
            in_specs=[pl.BlockSpec((batch_block, n_in), lambda i: (i, 0)),
                      pl.BlockSpec(w_packed.shape, lambda i: (0, 0))],
            out_specs=pl.BlockSpec((batch_block, out_dim), lambda i: (i, 0)),
            out_shape=out_shape,
            compiler_params=pltpu.CompilerParams(
                dimension_semantics=("parallel",)),
        )(state, w_packed)

    return out[:, :num_actions], out[:, num_actions:]


# ---------------------------- parameter creation ---------------------------- #
def init_kan(key, widths):
    """Deterministic synthetic init of a KAN with the given layer widths."""
    layers = []
    for i_dim, o_dim in zip(widths[:-1], widths[1:]):
        key, k1, k2 = jax.random.split(key, 3)
        limit = (6.0 / (i_dim + o_dim)) ** 0.5          # xavier-uniform style
        base_wT = jax.random.uniform(k1, (i_dim, o_dim), jnp.float32, -limit, limit)
        spline_w = 0.1 * jax.random.normal(
            k2, (NUM_COEF, i_dim, o_dim), jnp.float32)
        layers.append(dict(base_wT=base_wT, spline_w=spline_w))
    return layers, key


def init_policy(key, num_inputs, num_actions, hidden_dim):
    linear1, key = init_kan(key, [num_inputs, hidden_dim // 2, hidden_dim])
    mean_linear, key = init_kan(key, [hidden_dim, hidden_dim // 2, num_actions])
    log_std_linear, key = init_kan(key, [hidden_dim, hidden_dim // 2, num_actions])
    return dict(linear1=linear1, mean_linear=mean_linear,
                log_std_linear=log_std_linear)


def prepare_fused_params(params):
    """Merge the mean/log_std heads, fuse base+spline weights per KANLinear,
    pre-cast to bf16 and pack everything into ONE (K_total, O_max) array."""
    mean_l, std_l = params["mean_linear"], params["log_std_linear"]

    # Head sub-layer 0: identical input -> concatenate along the output axis.
    h0 = dict(
        base_wT=jnp.concatenate([mean_l[0]["base_wT"], std_l[0]["base_wT"]], axis=1),
        spline_w=jnp.concatenate([mean_l[0]["spline_w"], std_l[0]["spline_w"]], axis=2),
    )
    # Head sub-layer 1: disjoint input halves -> block-diagonal weights.
    # TODO(synk): for hidden_dim >= 256 switch to two half-width matmuls to
    # avoid the 2x FLOPs/bytes of the zero off-diagonal blocks.
    hi, act = mean_l[1]["base_wT"].shape
    base = jnp.zeros((2 * hi, 2 * act), jnp.float32)
    base = base.at[:hi, :act].set(mean_l[1]["base_wT"])
    base = base.at[hi:, act:].set(std_l[1]["base_wT"])
    spl = jnp.zeros((NUM_COEF, 2 * hi, 2 * act), jnp.float32)
    spl = spl.at[:, :hi, :act].set(mean_l[1]["spline_w"])
    spl = spl.at[:, hi:, act:].set(std_l[1]["spline_w"])
    h1 = dict(base_wT=base, spline_w=spl)

    layers = list(params["linear1"]) + [h0, h1]
    o_max = max(int(l["base_wT"].shape[1]) for l in layers)

    blocks, dims = [], []
    for layer in layers:
        i_dim, o_dim = (int(s) for s in layer["base_wT"].shape)
        n_blk, _ = _num_fold_blocks(i_dim)
        k_len = (n_blk + 1) * i_dim
        # Fused weight rows match the kernel operand [bases | silu]:
        #   [0, NUM_COEF*I)        : spline_w reshaped so row c*I+i = coeff[c, i]
        #   [NUM_COEF*I, n_blk*I)  : zeros (padding / junk basis blocks)
        #   [n_blk*I, n_blk*I + I) : base_wT
        w = jnp.zeros((k_len, o_max), jnp.float32)
        w = w.at[:NUM_COEF * i_dim, :o_dim].set(
            layer["spline_w"].reshape(NUM_COEF * i_dim, o_dim))
        w = w.at[n_blk * i_dim:, :o_dim].set(layer["base_wT"])
        blocks.append(w)
        dims.append((i_dim, o_dim))

    w_packed = jnp.concatenate(blocks, axis=0).astype(jnp.bfloat16)
    return w_packed, tuple(dims)


# --------------------------- pure-JAX reference ------------------------------ #
def _ref_kan_linear(x, layer):
    base_wT, spline_w = layer["base_wT"], layer["spline_w"]
    silu = x * (1.0 / (1.0 + jnp.exp(-x)))
    y = jnp.dot(silu.astype(jnp.bfloat16), base_wT.astype(jnp.bfloat16),
                preferred_element_type=jnp.float32)
    knots = (jnp.arange(-SPLINE_ORDER, GRID_SIZE + SPLINE_ORDER + 1,
                        dtype=jnp.float32) * _H + GRID_RANGE[0])
    g = [knots[j] for j in range(knots.shape[0])]
    bases = [jnp.where((x >= g[j]) & (x < g[j + 1]), 1.0, 0.0)
             for j in range(NUM_BASE0)]
    for k in range(1, SPLINE_ORDER + 1):
        bases = [(x - g[j]) / (g[j + k] - g[j]) * bases[j]
                 + (g[j + k + 1] - x) / (g[j + k + 1] - g[j + 1]) * bases[j + 1]
                 for j in range(len(bases) - 1)]
    for c in range(NUM_COEF):
        y = y + jnp.dot(bases[c].astype(jnp.bfloat16),
                        spline_w[c].astype(jnp.bfloat16),
                        preferred_element_type=jnp.float32)
    return y


def _ref_kan(x, layers):
    for layer in layers:
        x = _ref_kan_linear(x, layer)
    return x


def reference_forward(state, params):
    x = _ref_kan(state, params["linear1"])
    mean = _ref_kan(x, params["mean_linear"])
    log_std = jnp.clip(_ref_kan(x, params["log_std_linear"]),
                       LOG_SIG_MIN, LOG_SIG_MAX)
    return mean, log_std


# ----------------------------------- main ------------------------------------ #
if __name__ == "__main__":
    B, NUM_INPUTS, NUM_ACTIONS, HIDDEN = 8, 16, 8, 32

    key = jax.random.PRNGKey(0)
    key, k_state = jax.random.split(key)
    state = jax.random.normal(k_state, (B, NUM_INPUTS), jnp.float32)

    params = init_policy(key, NUM_INPUTS, NUM_ACTIONS, HIDDEN)
    w_packed, layer_dims = prepare_fused_params(params)

    fwd = jax.jit(functools.partial(k_gaussian_policy_forward,
                                    layer_dims=layer_dims))
    mean, log_std = fwd(state, w_packed)
    jax.block_until_ready((mean, log_std))

    assert mean.shape == (B, NUM_ACTIONS) and log_std.shape == (B, NUM_ACTIONS)
    assert bool(jnp.all(jnp.isfinite(mean))) and bool(jnp.all(jnp.isfinite(log_std)))
    assert bool(jnp.all(log_std >= LOG_SIG_MIN)) and bool(jnp.all(log_std <= LOG_SIG_MAX))

    # Independent pure-JAX reference (unfused heads, list-based Cox-de Boor).
    ref_mean, ref_log_std = jax.jit(reference_forward)(state, params)
    assert bool(jnp.allclose(mean, ref_mean, rtol=1e-2, atol=1e-2))
    assert bool(jnp.allclose(log_std, ref_log_std, rtol=1e-2, atol=1e-2))

    # Larger batch through the batch-parallel grid path (v7x 2-TC / VMEM guard).
    # Slightly looser tolerance: bf16 rounding amplified across 4 KANLinears.
    B2, BLOCK = 256, 128
    key, k_big = jax.random.split(key)
    state_big = jax.random.normal(k_big, (B2, NUM_INPUTS), jnp.float32)
    fwd_big = jax.jit(functools.partial(k_gaussian_policy_forward,
                                        layer_dims=layer_dims, batch_block=BLOCK))
    mean_b, log_std_b = fwd_big(state_big, w_packed)
    jax.block_until_ready((mean_b, log_std_b))
    ref_mean_b, ref_log_std_b = jax.jit(reference_forward)(state_big, params)
    assert mean_b.shape == (B2, NUM_ACTIONS) and log_std_b.shape == (B2, NUM_ACTIONS)
    assert bool(jnp.allclose(mean_b, ref_mean_b, rtol=2e-2, atol=2e-2))
    assert bool(jnp.allclose(log_std_b, ref_log_std_b, rtol=2e-2, atol=2e-2))

    print("KERNEL_OK")
</pallas_src>

<mosaic_0001>
module attributes {stable_mosaic.version = 11 : i64} {
  func.func @_policy_kernel(%arg0: memref<8x16xf32, #tpu.memory_space<vmem>>, %arg1: memref<1376x32xbf16, #tpu.memory_space<vmem>>, %arg2: memref<8x16xf32, #tpu.memory_space<vmem>>) attributes {dimension_semantics = [], scalar_prefetch = 0 : i64, scratch_operands = 0 : i64, tpu.core_type = #tpu.core_type<tc>} {
    %c0 = arith.constant 0 : index
    %c0_0 = arith.constant 0 : index
    %0 = vector.load %arg0[%c0, %c0_0] : memref<8x16xf32, #tpu.memory_space<vmem>>, vector<8x16xf32>
    %c0_1 = arith.constant 0 : index
    %c0_2 = arith.constant 0 : index
    %1 = vector.load %arg1[%c0_1, %c0_2] : memref<1376x32xbf16, #tpu.memory_space<vmem>>, vector<272x16xbf16>
    %cst = arith.constant 0.000000e+00 : f32
    %2 = vector.broadcast %cst : f32 to vector<8x16xf32>
    %3 = arith.subf %2, %0 : vector<8x16xf32>
    %4 = math.exp %3 : vector<8x16xf32>
    %cst_3 = arith.constant 1.000000e+00 : f32
    %5 = vector.broadcast %cst_3 : f32 to vector<8x16xf32>
    %6 = arith.addf %5, %4 : vector<8x16xf32>
    %cst_4 = arith.constant 1.000000e+00 : f32
    %7 = vector.broadcast %cst_4 : f32 to vector<8x16xf32>
    %8 = arith.divf %7, %6 : vector<8x16xf32>
    %9 = arith.mulf %0, %8 : vector<8x16xf32>
    %10 = tpu.concatenate %0, %0, %0, %0, %0, %0, %0, %0, %0, %0, %0, %0, %0, %0, %0, %0 in 1 : vector<8x16xf32>, vector<8x16xf32>, vector<8x16xf32>, vector<8x16xf32>, vector<8x16xf32>, vector<8x16xf32>, vector<8x16xf32>, vector<8x16xf32>, vector<8x16xf32>, vector<8x16xf32>, vector<8x16xf32>, vector<8x16xf32>, vector<8x16xf32>, vector<8x16xf32>, vector<8x16xf32>, vector<8x16xf32> -> vector<8x256xf32>
    %11 = tpu.iota {dimensions = array<i32: 1>} : vector<8x256xi32>
    %12 = arith.sitofp %11 : vector<8x256xi32> to vector<8x256xf32>
    %cst_5 = arith.constant 5.000000e-01 : f32
    %13 = vector.broadcast %cst_5 : f32 to vector<8x256xf32>
    %14 = arith.addf %12, %13 : vector<8x256xf32>
    %cst_6 = arith.constant 6.250000e-02 : f32
    %15 = vector.broadcast %cst_6 : f32 to vector<8x256xf32>
    %16 = arith.mulf %14, %15 : vector<8x256xf32>
    %17 = math.floor %16 : vector<8x256xf32>
    %cst_7 = arith.constant 4.000000e-01 : f32
    %18 = vector.broadcast %cst_7 : f32 to vector<8x256xf32>
    %19 = arith.mulf %17, %18 : vector<8x256xf32>
    %cst_8 = arith.constant -2.200000e+00 : f32
    %20 = vector.broadcast %cst_8 : f32 to vector<8x256xf32>
    %21 = arith.addf %20, %19 : vector<8x256xf32>
    %22 = arith.subf %10, %21 : vector<8x256xf32>
    %cst_9 = arith.constant 0.000000e+00 : f32
    %23 = vector.broadcast %cst_9 : f32 to vector<8x256xf32>
    %24 = arith.cmpf oge, %22, %23 : vector<8x256xf32>
    %cst_10 = arith.constant 4.000000e-01 : f32
    %25 = vector.broadcast %cst_10 : f32 to vector<8x256xf32>
    %26 = arith.cmpf olt, %22, %25 : vector<8x256xf32>
    %27 = arith.andi %24, %26 : vector<8x256xi1>
    %cst_11 = arith.constant 1.000000e+00 : f32
    %cst_12 = arith.constant 0.000000e+00 : f32
    %28 = vector.broadcast %cst_11 : f32 to vector<8x256xf32>
    %29 = vector.broadcast %cst_12 : f32 to vector<8x256xf32>
    %30 = arith.select %27, %28, %29 : vector<8x256xi1>, vector<8x256xf32>
    %c240_i32 = arith.constant 240 : i32
    %31 = tpu.dynamic_rotate %30 by %c240_i32 dim 1 : vector<8x256xf32>, i32 -> vector<8x256xf32>
    %32 = arith.mulf %22, %30 : vector<8x256xf32>
    %cst_13 = arith.constant 8.000000e-01 : f32
    %33 = vector.broadcast %cst_13 : f32 to vector<8x256xf32>
    %34 = arith.subf %33, %22 : vector<8x256xf32>
    %35 = arith.mulf %34, %31 : vector<8x256xf32>
    %36 = arith.addf %32, %35 : vector<8x256xf32>
    %cst_14 = arith.constant 2.500000e+00 : f32
    %37 = vector.broadcast %cst_14 : f32 to vector<8x256xf32>
    %38 = arith.mulf %36, %37 : vector<8x256xf32>
    %c240_i32_15 = arith.constant 240 : i32
    %39 = tpu.dynamic_rotate %38 by %c240_i32_15 dim 1 : vector<8x256xf32>, i32 -> vector<8x256xf32>
    %40 = arith.mulf %22, %38 : vector<8x256xf32>
    %cst_16 = arith.constant 1.200000e+00 : f32
    %41 = vector.broadcast %cst_16 : f32 to vector<8x256xf32>
    %42 = arith.subf %41, %22 : vector<8x256xf32>
    %43 = arith.mulf %42, %39 : vector<8x256xf32>
    %44 = arith.addf %40, %43 : vector<8x256xf32>
    %cst_17 = arith.constant 1.250000e+00 : f32
    %45 = vector.broadcast %cst_17 : f32 to vector<8x256xf32>
    %46 = arith.mulf %44, %45 : vector<8x256xf32>
    %c240_i32_18 = arith.constant 240 : i32
    %47 = tpu.dynamic_rotate %46 by %c240_i32_18 dim 1 : vector<8x256xf32>, i32 -> vector<8x256xf32>
    %48 = arith.mulf %22, %46 : vector<8x256xf32>
    %cst_19 = arith.constant 1.600000e+00 : f32
    %49 = vector.broadcast %cst_19 : f32 to vector<8x256xf32>
    %50 = arith.subf %49, %22 : vector<8x256xf32>
    %51 = arith.mulf %50, %47 : vector<8x256xf32>
    %52 = arith.addf %48, %51 : vector<8x256xf32>
    %cst_20 = arith.constant 0.833333313 : f32
    %53 = vector.broadcast %cst_20 : f32 to vector<8x256xf32>
    %54 = arith.mulf %52, %53 : vector<8x256xf32>
    %55 = arith.truncf %54 : vector<8x256xf32> to vector<8x256xbf16>
    %56 = arith.truncf %9 : vector<8x16xf32> to vector<8x16xbf16>
    %57 = tpu.concatenate %55, %56 in 1 : vector<8x256xbf16>, vector<8x16xbf16> -> vector<8x272xbf16>
    %cst_21 = arith.constant dense<0.000000e+00> : vector<8x16xf32>
    %58 = tpu.matmul %57, %1, %cst_21 {dimension_numbers = #tpu.dot_dimension_numbers<[1], [0], [0], [1], [0, 0, 1, 1], [], []>} : vector<8x272xbf16>, vector<272x16xbf16>, vector<8x16xf32> -> vector<8x16xf32>
    %c272 = arith.constant 272 : index
    %c0_22 = arith.constant 0 : index
    %59 = vector.load %arg1[%c272, %c0_22] : memref<1376x32xbf16, #tpu.memory_space<vmem>>, vector<272x32xbf16>
    %cst_23 = arith.constant 0.000000e+00 : f32
    %60 = vector.broadcast %cst_23 : f32 to vector<8x16xf32>
    %61 = arith.subf %60, %58 : vector<8x16xf32>
    %62 = math.exp %61 : vector<8x16xf32>
    %cst_24 = arith.constant 1.000000e+00 : f32
    %63 = vector.broadcast %cst_24 : f32 to vector<8x16xf32>
    %64 = arith.addf %63, %62 : vector<8x16xf32>
    %cst_25 = arith.constant 1.000000e+00 : f32
    %65 = vector.broadcast %cst_25 : f32 to vector<8x16xf32>
    %66 = arith.divf %65, %64 : vector<8x16xf32>
    %67 = arith.mulf %58, %66 : vector<8x16xf32>
    %68 = tpu.concatenate %58, %58, %58, %58, %58, %58, %58, %58, %58, %58, %58, %58, %58, %58, %58, %58 in 1 : vector<8x16xf32>, vector<8x16xf32>, vector<8x16xf32>, vector<8x16xf32>, vector<8x16xf32>, vector<8x16xf32>, vector<8x16xf32>, vector<8x16xf32>, vector<8x16xf32>, vector<8x16xf32>, vector<8x16xf32>, vector<8x16xf32>, vector<8x16xf32>, vector<8x16xf32>, vector<8x16xf32>, vector<8x16xf32> -> vector<8x256xf32>
    %69 = tpu.iota {dimensions = array<i32: 1>} : vector<8x256xi32>
    %70 = arith.sitofp %69 : vector<8x256xi32> to vector<8x256xf32>
    %cst_26 = arith.constant 5.000000e-01 : f32
    %71 = vector.broadcast %cst_26 : f32 to vector<8x256xf32>
    %72 = arith.addf %70, %71 : vector<8x256xf32>
    %cst_27 = arith.constant 6.250000e-02 : f32
    %73 = vector.broadcast %cst_27 : f32 to vector<8x256xf32>
    %74 = arith.mulf %72, %73 : vector<8x256xf32>
    %75 = math.floor %74 : vector<8x256xf32>
    %cst_28 = arith.constant 4.000000e-01 : f32
    %76 = vector.broadcast %cst_28 : f32 to vector<8x256xf32>
    %77 = arith.mulf %75, %76 : vector<8x256xf32>
    %cst_29 = arith.constant -2.200000e+00 : f32
    %78 = vector.broadcast %cst_29 : f32 to vector<8x256xf32>
    %79 = arith.addf %78, %77 : vector<8x256xf32>
    %80 = arith.subf %68, %79 : vector<8x256xf32>
    %cst_30 = arith.constant 0.000000e+00 : f32
    %81 = vector.broadcast %cst_30 : f32 to vector<8x256xf32>
    %82 = arith.cmpf oge, %80, %81 : vector<8x256xf32>
    %cst_31 = arith.constant 4.000000e-01 : f32
    %83 = vector.broadcast %cst_31 : f32 to vector<8x256xf32>
    %84 = arith.cmpf olt, %80, %83 : vector<8x256xf32>
    %85 = arith.andi %82, %84 : vector<8x256xi1>
    %cst_32 = arith.constant 1.000000e+00 : f32
    %cst_33 = arith.constant 0.000000e+00 : f32
    %86 = vector.broadcast %cst_32 : f32 to vector<8x256xf32>
    %87 = vector.broadcast %cst_33 : f32 to vector<8x256xf32>
    %88 = arith.select %85, %86, %87 : vector<8x256xi1>, vector<8x256xf32>
    %c240_i32_34 = arith.constant 240 : i32
    %89 = tpu.dynamic_rotate %88 by %c240_i32_34 dim 1 : vector<8x256xf32>, i32 -> vector<8x256xf32>
    %90 = arith.mulf %80, %88 : vector<8x256xf32>
    %cst_35 = arith.constant 8.000000e-01 : f32
    %91 = vector.broadcast %cst_35 : f32 to vector<8x256xf32>
    %92 = arith.subf %91, %80 : vector<8x256xf32>
    %93 = arith.mulf %92, %89 : vector<8x256xf32>
    %94 = arith.addf %90, %93 : vector<8x256xf32>
    %cst_36 = arith.constant 2.500000e+00 : f32
    %95 = vector.broadcast %cst_36 : f32 to vector<8x256xf32>
    %96 = arith.mulf %94, %95 : vector<8x256xf32>
    %c240_i32_37 = arith.constant 240 : i32
    %97 = tpu.dynamic_rotate %96 by %c240_i32_37 dim 1 : vector<8x256xf32>, i32 -> vector<8x256xf32>
    %98 = arith.mulf %80, %96 : vector<8x256xf32>
    %cst_38 = arith.constant 1.200000e+00 : f32
    %99 = vector.broadcast %cst_38 : f32 to vector<8x256xf32>
    %100 = arith.subf %99, %80 : vector<8x256xf32>
    %101 = arith.mulf %100, %97 : vector<8x256xf32>
    %102 = arith.addf %98, %101 : vector<8x256xf32>
    %cst_39 = arith.constant 1.250000e+00 : f32
    %103 = vector.broadcast %cst_39 : f32 to vector<8x256xf32>
    %104 = arith.mulf %102, %103 : vector<8x256xf32>
    %c240_i32_40 = arith.constant 240 : i32
    %105 = tpu.dynamic_rotate %104 by %c240_i32_40 dim 1 : vector<8x256xf32>, i32 -> vector<8x256xf32>
    %106 = arith.mulf %80, %104 : vector<8x256xf32>
    %cst_41 = arith.constant 1.600000e+00 : f32
    %107 = vector.broadcast %cst_41 : f32 to vector<8x256xf32>
    %108 = arith.subf %107, %80 : vector<8x256xf32>
    %109 = arith.mulf %108, %105 : vector<8x256xf32>
    %110 = arith.addf %106, %109 : vector<8x256xf32>
    %cst_42 = arith.constant 0.833333313 : f32
    %111 = vector.broadcast %cst_42 : f32 to vector<8x256xf32>
    %112 = arith.mulf %110, %111 : vector<8x256xf32>
    %113 = arith.truncf %112 : vector<8x256xf32> to vector<8x256xbf16>
    %114 = arith.truncf %67 : vector<8x16xf32> to vector<8x16xbf16>
    %115 = tpu.concatenate %113, %114 in 1 : vector<8x256xbf16>, vector<8x16xbf16> -> vector<8x272xbf16>
    %cst_43 = arith.constant dense<0.000000e+00> : vector<8x32xf32>
    %116 = tpu.matmul %115, %59, %cst_43 {dimension_numbers = #tpu.dot_dimension_numbers<[1], [0], [0], [1], [0, 0, 1, 1], [], []>} : vector<8x272xbf16>, vector<272x32xbf16>, vector<8x32xf32> -> vector<8x32xf32>
    %c544 = arith.constant 544 : index
    %c0_44 = arith.constant 0 : index
    %117 = vector.load %arg1[%c544, %c0_44] : memref<1376x32xbf16, #tpu.memory_space<vmem>>, vector<416x32xbf16>
    %cst_45 = arith.constant 0.000000e+00 : f32
    %118 = vector.broadcast %cst_45 : f32 to vector<8x32xf32>
    %119 = arith.subf %118, %116 : vector<8x32xf32>
    %120 = math.exp %119 : vector<8x32xf32>
    %cst_46 = arith.constant 1.000000e+00 : f32
    %121 = vector.broadcast %cst_46 : f32 to vector<8x32xf32>
    %122 = arith.addf %121, %120 : vector<8x32xf32>
    %cst_47 = arith.constant 1.000000e+00 : f32
    %123 = vector.broadcast %cst_47 : f32 to vector<8x32xf32>
    %124 = arith.divf %123, %122 : vector<8x32xf32>
    %125 = arith.mulf %116, %124 : vector<8x32xf32>
    %126 = tpu.concatenate %116, %116, %116, %116, %116, %116, %116, %116, %116, %116, %116, %116 in 1 : vector<8x32xf32>, vector<8x32xf32>, vector<8x32xf32>, vector<8x32xf32>, vector<8x32xf32>, vector<8x32xf32>, vector<8x32xf32>, vector<8x32xf32>, vector<8x32xf32>, vector<8x32xf32>, vector<8x32xf32>, vector<8x32xf32> -> vector<8x384xf32>
    %127 = tpu.iota {dimensions = array<i32: 1>} : vector<8x384xi32>
    %128 = arith.sitofp %127 : vector<8x384xi32> to vector<8x384xf32>
    %cst_48 = arith.constant 5.000000e-01 : f32
    %129 = vector.broadcast %cst_48 : f32 to vector<8x384xf32>
    %130 = arith.addf %128, %129 : vector<8x384xf32>
    %cst_49 = arith.constant 3.125000e-02 : f32
    %131 = vector.broadcast %cst_49 : f32 to vector<8x384xf32>
    %132 = arith.mulf %130, %131 : vector<8x384xf32>
    %133 = math.floor %132 : vector<8x384xf32>
    %cst_50 = arith.constant 4.000000e-01 : f32
    %134 = vector.broadcast %cst_50 : f32 to vector<8x384xf32>
    %135 = arith.mulf %133, %134 : vector<8x384xf32>
    %cst_51 = arith.constant -2.200000e+00 : f32
    %136 = vector.broadcast %cst_51 : f32 to vector<8x384xf32>
    %137 = arith.addf %136, %135 : vector<8x384xf32>
    %138 = arith.subf %126, %137 : vector<8x384xf32>
    %cst_52 = arith.constant 0.000000e+00 : f32
    %139 = vector.broadcast %cst_52 : f32 to vector<8x384xf32>
    %140 = arith.cmpf oge, %138, %139 : vector<8x384xf32>
    %cst_53 = arith.constant 4.000000e-01 : f32
    %141 = vector.broadcast %cst_53 : f32 to vector<8x384xf32>
    %142 = arith.cmpf olt, %138, %141 : vector<8x384xf32>
    %143 = arith.andi %140, %142 : vector<8x384xi1>
    %cst_54 = arith.constant 1.000000e+00 : f32
    %cst_55 = arith.constant 0.000000e+00 : f32
    %144 = vector.broadcast %cst_54 : f32 to vector<8x384xf32>
    %145 = vector.broadcast %cst_55 : f32 to vector<8x384xf32>
    %146 = arith.select %143, %144, %145 : vector<8x384xi1>, vector<8x384xf32>
    %c352_i32 = arith.constant 352 : i32
    %147 = tpu.dynamic_rotate %146 by %c352_i32 dim 1 : vector<8x384xf32>, i32 -> vector<8x384xf32>
    %148 = arith.mulf %138, %146 : vector<8x384xf32>
    %cst_56 = arith.constant 8.000000e-01 : f32
    %149 = vector.broadcast %cst_56 : f32 to vector<8x384xf32>
    %150 = arith.subf %149, %138 : vector<8x384xf32>
    %151 = arith.mulf %150, %147 : vector<8x384xf32>
    %152 = arith.addf %148, %151 : vector<8x384xf32>
    %cst_57 = arith.constant 2.500000e+00 : f32
    %153 = vector.broadcast %cst_57 : f32 to vector<8x384xf32>
    %154 = arith.mulf %152, %153 : vector<8x384xf32>
    %c352_i32_58 = arith.constant 352 : i32
    %155 = tpu.dynamic_rotate %154 by %c352_i32_58 dim 1 : vector<8x384xf32>, i32 -> vector<8x384xf32>
    %156 = arith.mulf %138, %154 : vector<8x384xf32>
    %cst_59 = arith.constant 1.200000e+00 : f32
    %157 = vector.broadcast %cst_59 : f32 to vector<8x384xf32>
    %158 = arith.subf %157, %138 : vector<8x384xf32>
    %159 = arith.mulf %158, %155 : vector<8x384xf32>
    %160 = arith.addf %156, %159 : vector<8x384xf32>
    %cst_60 = arith.constant 1.250000e+00 : f32
    %161 = vector.broadcast %cst_60 : f32 to vector<8x384xf32>
    %162 = arith.mulf %160, %161 : vector<8x384xf32>
    %c352_i32_61 = arith.constant 352 : i32
    %163 = tpu.dynamic_rotate %162 by %c352_i32_61 dim 1 : vector<8x384xf32>, i32 -> vector<8x384xf32>
    %164 = arith.mulf %138, %162 : vector<8x384xf32>
    %cst_62 = arith.constant 1.600000e+00 : f32
    %165 = vector.broadcast %cst_62 : f32 to vector<8x384xf32>
    %166 = arith.subf %165, %138 : vector<8x384xf32>
    %167 = arith.mulf %166, %163 : vector<8x384xf32>
    %168 = arith.addf %164, %167 : vector<8x384xf32>
    %cst_63 = arith.constant 0.833333313 : f32
    %169 = vector.broadcast %cst_63 : f32 to vector<8x384xf32>
    %170 = arith.mulf %168, %169 : vector<8x384xf32>
    %171 = arith.truncf %170 : vector<8x384xf32> to vector<8x384xbf16>
    %172 = arith.truncf %125 : vector<8x32xf32> to vector<8x32xbf16>
    %173 = tpu.concatenate %171, %172 in 1 : vector<8x384xbf16>, vector<8x32xbf16> -> vector<8x416xbf16>
    %cst_64 = arith.constant dense<0.000000e+00> : vector<8x32xf32>
    %174 = tpu.matmul %173, %117, %cst_64 {dimension_numbers = #tpu.dot_dimension_numbers<[1], [0], [0], [1], [0, 0, 1, 1], [], []>} : vector<8x416xbf16>, vector<416x32xbf16>, vector<8x32xf32> -> vector<8x32xf32>
    %c960 = arith.constant 960 : index
    %c0_65 = arith.constant 0 : index
    %175 = vector.load %arg1[%c960, %c0_65] : memref<1376x32xbf16, #tpu.memory_space<vmem>>, vector<416x16xbf16>
    %cst_66 = arith.constant 0.000000e+00 : f32
    %176 = vector.broadcast %cst_66 : f32 to vector<8x32xf32>
    %177 = arith.subf %176, %174 : vector<8x32xf32>
    %178 = math.exp %177 : vector<8x32xf32>
    %cst_67 = arith.constant 1.000000e+00 : f32
    %179 = vector.broadcast %cst_67 : f32 to vector<8x32xf32>
    %180 = arith.addf %179, %178 : vector<8x32xf32>
    %cst_68 = arith.constant 1.000000e+00 : f32
    %181 = vector.broadcast %cst_68 : f32 to vector<8x32xf32>
    %182 = arith.divf %181, %180 : vector<8x32xf32>
    %183 = arith.mulf %174, %182 : vector<8x32xf32>
    %184 = tpu.concatenate %174, %174, %174, %174, %174, %174, %174, %174, %174, %174, %174, %174 in 1 : vector<8x32xf32>, vector<8x32xf32>, vector<8x32xf32>, vector<8x32xf32>, vector<8x32xf32>, vector<8x32xf32>, vector<8x32xf32>, vector<8x32xf32>, vector<8x32xf32>, vector<8x32xf32>, vector<8x32xf32>, vector<8x32xf32> -> vector<8x384xf32>
    %185 = tpu.iota {dimensions = array<i32: 1>} : vector<8x384xi32>
    %186 = arith.sitofp %185 : vector<8x384xi32> to vector<8x384xf32>
    %cst_69 = arith.constant 5.000000e-01 : f32
    %187 = vector.broadcast %cst_69 : f32 to vector<8x384xf32>
    %188 = arith.addf %186, %187 : vector<8x384xf32>
    %cst_70 = arith.constant 3.125000e-02 : f32
    %189 = vector.broadcast %cst_70 : f32 to vector<8x384xf32>
    %190 = arith.mulf %188, %189 : vector<8x384xf32>
    %191 = math.floor %190 : vector<8x384xf32>
    %cst_71 = arith.constant 4.000000e-01 : f32
    %192 = vector.broadcast %cst_71 : f32 to vector<8x384xf32>
    %193 = arith.mulf %191, %192 : vector<8x384xf32>
    %cst_72 = arith.constant -2.200000e+00 : f32
    %194 = vector.broadcast %cst_72 : f32 to vector<8x384xf32>
    %195 = arith.addf %194, %193 : vector<8x384xf32>
    %196 = arith.subf %184, %195 : vector<8x384xf32>
    %cst_73 = arith.constant 0.000000e+00 : f32
    %197 = vector.broadcast %cst_73 : f32 to vector<8x384xf32>
    %198 = arith.cmpf oge, %196, %197 : vector<8x384xf32>
    %cst_74 = arith.constant 4.000000e-01 : f32
    %199 = vector.broadcast %cst_74 : f32 to vector<8x384xf32>
    %200 = arith.cmpf olt, %196, %199 : vector<8x384xf32>
    %201 = arith.andi %198, %200 : vector<8x384xi1>
    %cst_75 = arith.constant 1.000000e+00 : f32
    %cst_76 = arith.constant 0.000000e+00 : f32
    %202 = vector.broadcast %cst_75 : f32 to vector<8x384xf32>
    %203 = vector.broadcast %cst_76 : f32 to vector<8x384xf32>
    %204 = arith.select %201, %202, %203 : vector<8x384xi1>, vector<8x384xf32>
    %c352_i32_77 = arith.constant 352 : i32
    %205 = tpu.dynamic_rotate %204 by %c352_i32_77 dim 1 : vector<8x384xf32>, i32 -> vector<8x384xf32>
    %206 = arith.mulf %196, %204 : vector<8x384xf32>
    %cst_78 = arith.constant 8.000000e-01 : f32
    %207 = vector.broadcast %cst_78 : f32 to vector<8x384xf32>
    %208 = arith.subf %207, %196 : vector<8x384xf32>
    %209 = arith.mulf %208, %205 : vector<8x384xf32>
    %210 = arith.addf %206, %209 : vector<8x384xf32>
    %cst_79 = arith.constant 2.500000e+00 : f32
    %211 = vector.broadcast %cst_79 : f32 to vector<8x384xf32>
    %212 = arith.mulf %210, %211 : vector<8x384xf32>
    %c352_i32_80 = arith.constant 352 : i32
    %213 = tpu.dynamic_rotate %212 by %c352_i32_80 dim 1 : vector<8x384xf32>, i32 -> vector<8x384xf32>
    %214 = arith.mulf %196, %212 : vector<8x384xf32>
    %cst_81 = arith.constant 1.200000e+00 : f32
    %215 = vector.broadcast %cst_81 : f32 to vector<8x384xf32>
    %216 = arith.subf %215, %196 : vector<8x384xf32>
    %217 = arith.mulf %216, %213 : vector<8x384xf32>
    %218 = arith.addf %214, %217 : vector<8x384xf32>
    %cst_82 = arith.constant 1.250000e+00 : f32
    %219 = vector.broadcast %cst_82 : f32 to vector<8x384xf32>
    %220 = arith.mulf %218, %219 : vector<8x384xf32>
    %c352_i32_83 = arith.constant 352 : i32
    %221 = tpu.dynamic_rotate %220 by %c352_i32_83 dim 1 : vector<8x384xf32>, i32 -> vector<8x384xf32>
    %222 = arith.mulf %196, %220 : vector<8x384xf32>
    %cst_84 = arith.constant 1.600000e+00 : f32
    %223 = vector.broadcast %cst_84 : f32 to vector<8x384xf32>
    %224 = arith.subf %223, %196 : vector<8x384xf32>
    %225 = arith.mulf %224, %221 : vector<8x384xf32>
    %226 = arith.addf %222, %225 : vector<8x384xf32>
    %cst_85 = arith.constant 0.833333313 : f32
    %227 = vector.broadcast %cst_85 : f32 to vector<8x384xf32>
    %228 = arith.mulf %226, %227 : vector<8x384xf32>
    %229 = arith.truncf %228 : vector<8x384xf32> to vector<8x384xbf16>
    %230 = arith.truncf %183 : vector<8x32xf32> to vector<8x32xbf16>
    %231 = tpu.concatenate %229, %230 in 1 : vector<8x384xbf16>, vector<8x32xbf16> -> vector<8x416xbf16>
    %cst_86 = arith.constant dense<0.000000e+00> : vector<8x16xf32>
    %232 = tpu.matmul %231, %175, %cst_86 {dimension_numbers = #tpu.dot_dimension_numbers<[1], [0], [0], [1], [0, 0, 1, 1], [], []>} : vector<8x416xbf16>, vector<416x16xbf16>, vector<8x16xf32> -> vector<8x16xf32>
    %233 = tpu.iota {dimensions = array<i32: 1>} : vector<8x16xi32>
    %c8_i32 = arith.constant 8 : i32
    %234 = vector.broadcast %c8_i32 : i32 to vector<8x16xi32>
    %235 = arith.cmpi sge, %233, %234 : vector<8x16xi32>
    %cst_87 = arith.constant -2.000000e+01 : f32
    %cst_88 = arith.constant 2.000000e+00 : f32
    %236 = vector.broadcast %cst_87 : f32 to vector<8x16xf32>
    %237 = arith.maximumf %236, %232 : vector<8x16xf32>
    %238 = vector.broadcast %cst_88 : f32 to vector<8x16xf32>
    %239 = arith.minimumf %238, %237 : vector<8x16xf32>
    %240 = arith.select %235, %239, %232 : vector<8x16xi1>, vector<8x16xf32>
    %c0_89 = arith.constant 0 : index
    %c0_90 = arith.constant 0 : index
    %241 = vector.load %arg2[%c0_89, %c0_90] : memref<8x16xf32, #tpu.memory_space<vmem>>, vector<8x16xf32>
    tpu.vector_store %arg2[%c0_89, %c0_90], %240 {strides = array<i32>} : memref<8x16xf32, #tpu.memory_space<vmem>>, vector<8x16xf32>,
    return
  }
}

</mosaic_0001>

<bundles_post_ra>
// kernel: k_gaussian_policy_forward.1
= control target key start
LH: loop header
LB: loop body
LE: loop exit
PB: predicated region body
PF: predicated region fallthrough
CT: control target
= control target key end

     0   :  { %s1823_s11 = smov 16   ;;  %s1824_s12 = smov 48   ;;  %v1827_v1 = vmov 0.0   ;;  %v90_v2 = vlaneseq  ;;  %vm76_vm0 = vcmask 130048   ;;  %vm78_vm1 = vcmask 261120   ;;  %s2455_s0 = inlined_call_operand.vmem [shape: f32[8,16], index: 0, kind: input, shape index: {}]   ;;  %s2456_s1 = inlined_call_operand.vmem [shape: bf16[1376,32], index: 1, kind: input, shape index: {}]   ;;  %s2457_s2 = inlined_call_operand.vmem [shape: f32[8,16], index: 2, kind: output, shape index: {}]  }
   0x1   :  { %v1851_v0 = vld [vmem:[%s2455_s0] sm:$0xff]  ;;  %s1825_s13 = smov 32   ;;  %s1826_s14 = smov 64   ;;  %1679 = vmatprep.subr.bf16.mxu1 %v1827_v1  ;;  %vm80_vm2 = vcmask 392192   ;;  %vm82_vm3 = vcmask 523264   ;;  %vm84_vm4 = vcmask 654336  }
   0x2   :  { %55 = vrot.lane.b32.xlu0 %v1851_v0, %s1823_s11  ;;  %61 = vrot.lane.b32.xlu1 %v1851_v0, %s1824_s12  ;;  %s1828_s0 = smov 80   ;;  %s1829_s15 = smov 96   ;;  %v1868_v3 = vand.u32 127, %v90_v2  ;;  %vm86_vm5 = vcmask 785408   ;;  %vm88_vm6 = vcmask 916480   ;;  %v1721_v47 = vld [vmem:[%s2456_s1 + $0x40] sm:$0xff]  }
   0x3   :  { %s1830_s16 = smov 112   ;;  %v1722_v50 = vld [vmem:[%s2456_s1] sm:$0xff]   ;;  %1587 = vmatprep.subr.bf16.mxu0 %v1721_v47  ;;  %v1723_v51 = vld [vmem:[%s2456_s1 + $0x48] sm:$0xff]   ;;  %v1725_v55 = vld [vmem:[%s2456_s1 + $0x50] sm:$0xff]   ;;  %v47_v63 = vsub.f32 0.0, %v1851_v0  ;;  %vm1831_vm14 = vmmov 0  }
   0x4   :  { %v92_v4 = vadd.s32 128, %v1868_v3  ;;  %v93_v5 = vcvt.s32.f32 %v1868_v3  ;;  %vm119_vm13 = vcmp.lt.s32.totalorder %v1868_v3, 112  ;;  %1588 = vmatpush3.bf16.msra.mxu0 %v1722_v50  ;;  %v1724_v54 = vld [vmem:[%s2456_s1 + $0x8] sm:$0xff]   ;;  %v1726_v56 = vld [vmem:[%s2456_s1 + $0x10] sm:$0xff]   ;;  %v1727_v57 = vld [vmem:[%s2456_s1 + $0x58] sm:$0xff]   ;;  %1681 = vmatprep.mubr.msk.bf16.mxu1 %vm1831_vm14, %v1827_v1 }
   0x5   :  { %1589 = vmatprep.subr.bf16.mxu0 %v1723_v51  ;;  %v1728_v58 = vld [vmem:[%s2456_s1 + $0x18] sm:$0xff]   ;;  %v1729_v59 = vld [vmem:[%s2456_s1 + $0x60] sm:$0xff]   ;;  %v1731_v61 = vld [vmem:[%s2456_s1 + $0x68] sm:$0xff]   ;;  %v48_v2 = vmul.f32 1.442695, %v47_v63 }
   0x6   :  { %58 = vrot.lane.b32.xlu0 %v1851_v0, %s1825_s13  ;;  %64 = vrot.lane.b32.xlu1 %v1851_v0, %s1826_s14  ;;  %v94_v6 = vcvt.s32.f32 %v92_v4  ;;  %v1872_v7 = vadd.f32 0.5, %v93_v5  ;;  %v1730_v60 = vld [vmem:[%s2456_s1 + $0x20] sm:$0xff]   ;;  %v1732_v62 = vld [vmem:[%s2456_s1 + $0x28] sm:$0xff]  }
   0x7   :  { %1807 = vpow2.f32 %v48_v2 }
   0x8   :  { %v1874_v8 = vadd.f32 0.5, %v94_v6  ;;  %v97_v9 = vmul.f32 0.0625, %v1872_v7  ;;  %1590 = vmatpush3.bf16.msra.mxu0 %v1724_v54  ;;  %v1733_v6 = vld [vmem:[%s2456_s1 + $0x70] sm:$0xff]  }
   0x9   :  { %1591 = vmatprep.subr.bf16.mxu0 %v1725_v55 }
   0xa   :  { %67 = vrot.lane.b32.xlu0 %v1851_v0, %s1828_s0  ;;  %70 = vrot.lane.b32.xlu1 %v1851_v0, %s1829_s15  ;;  %v98_v10 = vmul.f32 0.0625, %v1874_v8  ;;  %v99_v13 = vfloor.f32 %v97_v9  ;;  %v1734_v9 = vld [vmem:[%s2456_s1 + $0x30] sm:$0xff]  }
   0xc   :  { %v100_v14 = vfloor.f32 %v98_v10  ;;  %v101_v20 = vmul.f32 0.4, %v99_v13  ;;  %1592 = vmatpush3.bf16.msra.mxu0 %v1726_v56  ;;  %v1735_v10 = vld [vmem:[%s2456_s1 + $0x78] sm:$0xff]  }
   0xd   :  { %1593 = vmatprep.subr.bf16.mxu0 %v1727_v57 }
   0xe   :  { %73 = vrot.lane.b32.xlu0 %v1851_v0, %s1830_s16  ;;  %v102_v21 = vmul.f32 0.4, %v100_v14  ;;  %v1884_v26 = vadd.f32 -2.2, %v101_v20 }
  0x10   :  { %v1886_v27 = vadd.f32 -2.2, %v102_v21  ;;  %1594 = vmatpush3.bf16.msra.mxu0 %v1728_v58 }
  0x11   :  { %1595 = vmatprep.subr.bf16.mxu0 %v1729_v59  ;;  %v1808_v4 = vpop.eup %1807 }
  0x12   :  { %v50_v5 = vadd.f32 1.0, %v1808_v4 }
  0x14   :  { %1596 = vmatpush3.bf16.msra.mxu0 %v1730_v60  ;;  %1809 = vrcp.f32 %v50_v5 }
  0x15   :  { %1597 = vmatprep.subr.bf16.mxu0 %v1731_v61 }
  0x18   :  { %1598 = vmatpush3.bf16.msra.mxu0 %v1732_v62 }
  0x19   :  { %1599 = vmatprep.subr.bf16.mxu0 %v1733_v6 }
  0x1c   :  { %1600 = vmatpush3.bf16.msra.mxu0 %v1734_v9 }
  0x1d   :  { %1601 = vmatprep.subr.bf16.mxu0 %v1735_v10 }
  0x74   :  { %v56_v11 = vpop.permute.xlu0 %55  ;;  %v62_v12 = vpop.permute.xlu1 %61 }
  0x75   :  { %v77_v15 = vsel %vm76_vm0, %v1851_v0, %v56_v11  ;;  %v1737_v11 = vld [vmem:[%s2456_s1 + $0x80] sm:$0xff]  }
  0x76   :  { %1680 = vmatpush3.bf16.msra.mxu1 %v1737_v11 }
  0x78   :  { %v59_v16 = vpop.permute.xlu0 %58  ;;  %v65_v17 = vpop.permute.xlu1 %64 }
  0x79   :  { %v79_v18 = vsel %vm78_vm1, %v77_v15, %v59_v16  ;;  %v1736_v16 = vld [vmem:[%s2456_s1 + $0x38] sm:$0xff]  }
  0x7a   :  { %v81_v19 = vsel %vm80_vm2, %v79_v18, %v62_v12  ;;  %1602 = vmatpush3.bf16.msra.mxu0 %v1736_v16 }
  0x7b   :  { %v83_v22 = vsel %vm82_vm3, %v81_v19, %v65_v17  ;;  %v1810_v19 = vpop.eup %1809 }
  0x7c   :  { %v68_v23 = vpop.permute.xlu0 %67  ;;  %v71_v25 = vpop.permute.xlu1 %70 }
  0x7d   :  { %v85_v24 = vsel %vm84_vm4, %v83_v22, %v68_v23 }
  0x7e   :  { %v87_v28 = vsel %vm86_vm5, %v85_v24, %v71_v25  ;;  %v53_v24 = vmul.f32 %v1810_v19, %v1851_v0 }
  0x80   :  { %v74_v29 = vpop.permute.xlu0 %73 }
  0x81   :  { %v89_v30 = vsel %vm88_vm6, %v87_v28, %v74_v29  ;;  %v166_v29 = vpack.c.bf16 %v53_v24, %v53_v24 }
  0x82   :  { %v1891_v31 = vsub.f32 %v89_v30, %v1884_v26  ;;  %v1894_v32 = vsub.f32 %v89_v30, %v1886_v27 }
  0x83   :  { %1682 = vmatmul.mubr.msk.bf16.vlgmr.msra.gmra.mrb[0].mxu1 %vm76_vm0, %v166_v29  ;;  %v1739_v29 = vld [vmem:[%s2456_s1 + $0x88] sm:$0xff]  }
  0x84   :  { %vm107_vm7 = vcmp.ge.f32.partialorder %v1891_v31, 0.0  ;;  %vm108_vm8 = vcmp.ge.f32.partialorder %v1894_v32, 0.0  ;;  %vm109_vm9 = vcmp.lt.f32.partialorder %v1891_v31, 0.4  ;;  %vm110_vm10 = vcmp.lt.f32.partialorder %v1894_v32, 0.4 }
  0x85   :  { %vm111_vm11 = vmand %vm107_vm7, %vm109_vm9  ;;  %v125_v39 = vsub.f32 0.8, %v1894_v32  ;;  %v124_v40 = vsub.f32 0.8, %v1891_v31  ;;  %v140_v13 = vsub.f32 1.2, %v1891_v31 }
  0x86   :  { %vm112_vm12 = vmand %vm108_vm8, %vm110_vm10  ;;  %v113_v33 = vsel %vm111_vm11, 1.0, %v1827_v1  ;;  %v141_v14 = vsub.f32 1.2, %v1894_v32  ;;  %v157_v0 = vsub.f32 1.6, %v1894_v32 }
  0x87   :  { %v114_v34 = vsel %vm112_vm12, 1.0, %v1827_v1  ;;  %v122_v44 = vmul.f32 %v113_v33, %v1891_v31 }
  0x88   :  { %v1701_v35 = vpack.i.bf16 %v114_v34, %v113_v33  ;;  %v123_v43 = vmul.f32 %v114_v34, %v1894_v32 }
  0x8a   :  { %1702 = vrot.lane.b32.xlu1 %v1701_v35, %s1830_s16  ;;  %v156_v35 = vsub.f32 1.6, %v1891_v31 }
  0xfc   :  { %v1703_v36 = vpop.permute.xlu1 %1702 }
  0xfd   :  { %v1705_v37 = vunpack.i.h.bf16 %v1703_v36  ;;  %v1704_v38 = vunpack.i.l.bf16 %v1703_v36 }
  0xff   :  { %v120_v41 = vsel %vm119_vm13, %v1704_v38, %v1705_v37  ;;  %v121_v42 = vsel %vm119_vm13, %v1705_v37, %v1704_v38 }
 0x100   :  { %v127_v45 = vmul.f32 %v125_v39, %v121_v42  ;;  %v126_v46 = vmul.f32 %v124_v40, %v120_v41 }
 0x102   :  { %v129_v48 = vadd.f32 %v127_v45, %v123_v43  ;;  %v128_v49 = vadd.f32 %v126_v46, %v122_v44 }
 0x104   :  { %v131_v52 = vmul.f32 2.5, %v129_v48  ;;  %v130_v53 = vmul.f32 2.5, %v128_v49 }
 0x106   :  { %134 = vrot.lane.b32.xlu1 %v131_v52, %s1830_s16  ;;  %132 = vrot.lane.b32.xlu0 %v130_v53, %s1830_s16  ;;  %v139_v20 = vmul.f32 %v131_v52, %v1894_v32  ;;  %v138_v21 = vmul.f32 %v130_v53, %v1891_v31 }
 0x156   :  { %v346_v49 = vpop.f32.mrb[0].mxu1 }
 0x157   :  { %v1683_v50 = vpop.f32.mrb[1].mxu1 }
 0x158   :  { %v349_v51 = vpop.f32.mrb[2].mxu1 }
 0x159   :  { %v1684_v52 = vpop.f32.mrb[3].mxu1 }
 0x178   :  { %v135_v12 = vpop.permute.xlu1 %134  ;;  %v133_v15 = vpop.permute.xlu0 %132 }
 0x179   :  { %v136_v17 = vsel %vm119_vm13, %v133_v15, %v135_v12  ;;  %v137_v18 = vsel %vm119_vm13, %v135_v12, %v133_v15 }
 0x17a   :  { %v142_v22 = vmul.f32 %v140_v13, %v136_v17  ;;  %v143_v23 = vmul.f32 %v141_v14, %v137_v18 }
 0x17c   :  { %v145_v25 = vadd.f32 %v143_v23, %v139_v20  ;;  %v144_v28 = vadd.f32 %v142_v22, %v138_v21 }
 0x17e   :  { %v147_v30 = vmul.f32 1.25, %v145_v25  ;;  %v146_v33 = vmul.f32 1.25, %v144_v28  ;;  %v1738_v28 = vld [vmem:[%s2456_s1 + $0xc8] sm:$0xff]  }
 0x17f   :  { %1611 = vmatprep.subr.bf16.mxu1 %v1738_v28 }
 0x180   :  { %150 = vrot.lane.b32.xlu1 %v147_v30, %s1830_s16  ;;  %148 = vrot.lane.b32.xlu0 %v146_v33, %s1830_s16  ;;  %v154_v39 = vmul.f32 %v146_v33, %v1891_v31  ;;  %v155_v42 = vmul.f32 %v147_v30, %v1894_v32  ;;  %v1740_v30 = vld [vmem:[%s2456_s1 + $0xd0] sm:$0xff]  }
 0x181   :  { %1612 = vmatpush3.bf16.msra.mxu1 %v1739_v29 }
 0x182   :  { %1613 = vmatprep.subr.bf16.mxu1 %v1740_v30 }
 0x1f2   :  { %v151_v34 = vpop.permute.xlu1 %150  ;;  %v149_v36 = vpop.permute.xlu0 %148 }
 0x1f3   :  { %v152_v37 = vsel %vm119_vm13, %v149_v36, %v151_v34  ;;  %v153_v38 = vsel %vm119_vm13, %v151_v34, %v149_v36 }
 0x1f4   :  { %v158_v40 = vmul.f32 %v156_v35, %v152_v37  ;;  %v159_v41 = vmul.f32 %v157_v0, %v153_v38  ;;  %v1741_v35 = vld [vmem:[%s2456_s1 + $0x90] sm:$0xff]   ;;  %v1742_v37 = vld [vmem:[%s2456_s1 + $0xd8] sm:$0xff]  }
 0x1f5   :  { %1614 = vmatpush3.bf16.msra.mxu1 %v1741_v35  ;;  %v1743_v38 = vld [vmem:[%s2456_s1 + $0x98] sm:$0xff]  }
 0x1f6   :  { %v160_v43 = vadd.f32 %v158_v40, %v154_v39  ;;  %v161_v44 = vadd.f32 %v159_v41, %v155_v42  ;;  %1615 = vmatprep.subr.bf16.mxu1 %v1742_v37  ;;  %v1744_v39 = vld [vmem:[%s2456_s1 + $0xe0] sm:$0xff]   ;;  %v1746_v41 = vld [vmem:[%s2456_s1 + $0xe8] sm:$0xff]  }
 0x1f7   :  { %v1745_v40 = vld [vmem:[%s2456_s1 + $0xa0] sm:$0xff]   ;;  %v1747_v42 = vld [vmem:[%s2456_s1 + $0xa8] sm:$0xff]  }
 0x1f8   :  { %v163_v45 = vmul.f32 0.8333333, %v161_v44  ;;  %v162_v46 = vmul.f32 0.8333333, %v160_v43  ;;  %v1748_v43 = vld [vmem:[%s2456_s1 + $0xf0] sm:$0xff]  }
 0x1f9   :  { %1616 = vmatpush3.bf16.msra.mxu1 %v1743_v38  ;;  %v1749_v44 = vld [vmem:[%s2456_s1 + $0xb0] sm:$0xff]  }
 0x1fa   :  { %v165_v47 = vpack.c.bf16 %v163_v45, %v163_v45  ;;  %v164_v48 = vpack.c.bf16 %v162_v46, %v162_v46  ;;  %1617 = vmatprep.subr.bf16.mxu1 %v1744_v39  ;;  %v1750_v45 = vld [vmem:[%s2456_s1 + $0xf8] sm:$0xff]  }
 0x1fb   :  { %v1751_v46 = vld [vmem:[%s2456_s1 + $0xb8] sm:$0xff]  }
 0x1fc   :  { %304 = vmatprep.mubr.bf16.mxu0 %v165_v47 }
 0x1fd   :  { %305 = vmatmul.mubr.bf16.vlgmr.msra.gmra.mrb[0].mxu0 %v164_v48  ;;  %1618 = vmatpush3.bf16.msra.mxu1 %v1745_v40 }
 0x1fe   :  { %1619 = vmatprep.subr.bf16.mxu1 %v1746_v41 }
 0x201   :  { %1620 = vmatpush3.bf16.msra.mxu1 %v1747_v42 }
 0x202   :  { %1621 = vmatprep.subr.bf16.mxu1 %v1748_v43 }
 0x205   :  { %1622 = vmatpush3.bf16.msra.mxu1 %v1749_v44  ;;  %v740_v44 = vadd.s32 256, %v1868_v3 }
 0x206   :  { %1623 = vmatprep.subr.bf16.mxu1 %v1750_v45 }
 0x207   :  { %v741_v45 = vcvt.s32.f32 %v740_v44  ;;  %v1767_v44 = vld [vmem:[%s2456_s1 + $0x128] sm:$0xff]  }
 0x209   :  { %1624 = vmatpush3.bf16.msra.mxu1 %v1751_v46  ;;  %v742_v46 = vadd.f32 0.5, %v741_v45  ;;  %v1769_v45 = vld [vmem:[%s2456_s1 + $0x170] sm:$0xff]  }
 0x2d0   :  { %v1603_v53 = vpop.f32.mrb[0].mxu0 }
 0x2d1   :  { %v1604_v54 = vpop.f32.mrb[1].mxu0 }
 0x2d2   :  { %v1605_v55 = vadd.f32 %v1604_v54, %v1603_v53  ;;  %v1606_v31 = vpop.f32.mrb[2].mxu0  ;;  %v1752_v53 = vld [vmem:[%s2456_s1 + $0x100] sm:$0xff]  }
 0x2d3   :  { %v1607_v56 = vpop.f32.mrb[3].mxu0  ;;  %1625 = vmatprep.subr.bf16.mxu1 %v1752_v53 }
 0x2d4   :  { %v1988_v57 = vadd.f32 %v1605_v55, %v346_v49 }
 0x2d6   :  { %397 = vrot.lane.b32.xlu1 %v1988_v57, %s1825_s13  ;;  %394 = vrot.lane.b32.xlu0 %v1988_v57, %s1823_s11 }
 0x2da   :  { %403 = vrot.lane.b32.xlu1 %v1988_v57, %s1826_s14  ;;  %400 = vrot.lane.b32.xlu0 %v1988_v57, %s1824_s12 }
 0x2de   :  { %409 = vrot.lane.b32.xlu1 %v1988_v57, %s1829_s15  ;;  %406 = vrot.lane.b32.xlu0 %v1988_v57, %s1828_s0 }
 0x2e2   :  { %412 = vrot.lane.b32.xlu0 %v1988_v57, %s1830_s16 }
 0x348   :  { %v398_v32 = vpop.permute.xlu1 %397  ;;  %v395_v58 = vpop.permute.xlu0 %394 }
 0x349   :  { %v415_v59 = vsel %vm76_vm0, %v1988_v57, %v395_v58 }
 0x34a   :  { %v416_v61 = vsel %vm78_vm1, %v415_v59, %v398_v32  ;;  %v1753_v32 = vld [vmem:[%s2456_s1 + $0xc0] sm:$0xff]  }
 0x34b   :  { %1626 = vmatpush3.bf16.msra.mxu1 %v1753_v32 }
 0x34c   :  { %v404_v60 = vpop.permute.xlu1 %403  ;;  %v401_v62 = vpop.permute.xlu0 %400  ;;  %1685 = vmatprep.subr.bf16.mxu1 %v1827_v1 }
 0x34d   :  { %v417_v63 = vsel %vm80_vm2, %v416_v61, %v401_v62  ;;  %v386_v62 = vsub.f32 0.0, %v1988_v57 }
 0x34e   :  { %v418_v2 = vsel %vm82_vm3, %v417_v63, %v404_v60 }
 0x34f   :  { %v387_v63 = vmul.f32 1.442695, %v386_v62 }
 0x350   :  { %v407_v4 = vpop.permute.xlu0 %406  ;;  %v410_v5 = vpop.permute.xlu1 %409 }
 0x351   :  { %v419_v6 = vsel %vm84_vm4, %v418_v2, %v407_v4  ;;  %1811 = vpow2.f32 %v387_v63 }
 0x352   :  { %v420_v9 = vsel %vm86_vm5, %v419_v6, %v410_v5 }
 0x354   :  { %v413_v10 = vpop.permute.xlu0 %412 }
 0x355   :  { %v421_v11 = vsel %vm88_vm6, %v420_v9, %v413_v10 }
 0x356   :  { %v2013_v12 = vsub.f32 %v421_v11, %v1884_v26  ;;  %v2016_v13 = vsub.f32 %v421_v11, %v1886_v27 }
 0x358   :  { %vm424_vm15 = vcmp.ge.f32.partialorder %v2013_v12, 0.0  ;;  %vm425_vm2 = vcmp.ge.f32.partialorder %v2016_v13, 0.0  ;;  %vm426_vm7 = vcmp.lt.f32.partialorder %v2013_v12, 0.4  ;;  %vm427_vm8 = vcmp.lt.f32.partialorder %v2016_v13, 0.4 }
 0x359   :  { %vm428_vm4 = vmand %vm424_vm15, %vm426_vm7  ;;  %v441_v18 = vsub.f32 0.8, %v2016_v13  ;;  %v440_v19 = vsub.f32 0.8, %v2013_v12  ;;  %v456_v48 = vsub.f32 1.2, %v2013_v12 }
 0x35a   :  { %vm429_vm9 = vmand %vm425_vm2, %vm427_vm8  ;;  %v430_v14 = vsel %vm428_vm4, 1.0, %v1827_v1  ;;  %v457_v49 = vsub.f32 1.2, %v2016_v13  ;;  %v472_v6 = vsub.f32 1.6, %v2013_v12  ;;  %vm776_vm8 = vcmp.lt.s32.totalorder %v1868_v3, 96 }
 0x35b   :  { %v431_v15 = vsel %vm429_vm9, 1.0, %v1827_v1  ;;  %v438_v23 = vmul.f32 %v430_v14, %v2013_v12  ;;  %v1812_v2 = vpop.eup %1811  ;;  %v473_v9 = vsub.f32 1.6, %v2016_v13 }
 0x35c   :  { %v1706_v16 = vpack.i.bf16 %v431_v15, %v430_v14  ;;  %v439_v22 = vmul.f32 %v431_v15, %v2016_v13  ;;  %v389_v4 = vadd.f32 1.0, %v1812_v2 }
 0x35e   :  { %1707 = vrot.lane.b32.xlu1 %v1706_v16, %s1830_s16  ;;  %1813 = vrcp.f32 %v389_v4 }
 0x3d0   :  { %v1708_v26 = vpop.permute.xlu1 %1707 }
 0x3d1   :  { %v1710_v27 = vunpack.i.h.bf16 %v1708_v26  ;;  %v1709_v17 = vunpack.i.l.bf16 %v1708_v26 }
 0x3d3   :  { %v436_v20 = vsel %vm119_vm13, %v1709_v17, %v1710_v27  ;;  %v437_v21 = vsel %vm119_vm13, %v1710_v27, %v1709_v17 }
 0x3d4   :  { %v443_v24 = vmul.f32 %v441_v18, %v437_v21  ;;  %v442_v25 = vmul.f32 %v440_v19, %v436_v20 }
 0x3d6   :  { %v445_v33 = vadd.f32 %v443_v24, %v439_v22  ;;  %v444_v34 = vadd.f32 %v442_v25, %v438_v23  ;;  %v1754_v23 = vld [vmem:[%s2456_s1 + $0x108] sm:$0xff]   ;;  %v1814_v24 = vpop.eup %1813 }
 0x3d8   :  { %v447_v0 = vmul.f32 2.5, %v445_v33  ;;  %v446_v36 = vmul.f32 2.5, %v444_v34 }
 0x3da   :  { %450 = vrot.lane.b32.xlu1 %v447_v0, %s1830_s16  ;;  %448 = vrot.lane.b32.xlu0 %v446_v36, %s1830_s16  ;;  %v455_v54 = vmul.f32 %v447_v0, %v2016_v13  ;;  %v454_v55 = vmul.f32 %v446_v36, %v2013_v12 }
 0x44c   :  { %v451_v47 = vpop.permute.xlu1 %450  ;;  %v449_v50 = vpop.permute.xlu0 %448 }
 0x44d   :  { %v452_v51 = vsel %vm119_vm13, %v449_v50, %v451_v47  ;;  %v453_v52 = vsel %vm119_vm13, %v451_v47, %v449_v50  ;;  %v743_v47 = vmul.f32 0.03125, %v1872_v7 }
 0x44e   :  { %v458_v31 = vmul.f32 %v456_v48, %v452_v51  ;;  %v459_v56 = vmul.f32 %v457_v49, %v453_v52  ;;  %v744_v48 = vmul.f32 0.03125, %v1874_v8  ;;  %v745_v49 = vmul.f32 0.03125, %v742_v46  ;;  %v1765_v46 = vld [vmem:[%s2456_s1 + $0x1b0] sm:$0xff]  }
 0x44f   :  { %v746_v50 = vfloor.f32 %v743_v47  ;;  %v1770_v47 = vld [vmem:[%s2456_s1 + $0x130] sm:$0xff]  }
 0x450   :  { %v461_v58 = vadd.f32 %v459_v56, %v455_v54  ;;  %v460_v59 = vadd.f32 %v458_v31, %v454_v55  ;;  %v747_v51 = vfloor.f32 %v744_v48  ;;  %v748_v52 = vfloor.f32 %v745_v49  ;;  %v1768_v48 = vld [vmem:[%s2456_s1 + $0x1b8] sm:$0xff]   ;;  %v1771_v49 = vld [vmem:[%s2456_s1 + $0x1c0] sm:$0xff]  }
 0x451   :  { %v749_v53 = vmul.f32 0.4, %v746_v50 }
 0x452   :  { %v463_v60 = vmul.f32 1.25, %v461_v58  ;;  %v462_v61 = vmul.f32 1.25, %v460_v59  ;;  %v750_v54 = vmul.f32 0.4, %v747_v51  ;;  %v751_v55 = vmul.f32 0.4, %v748_v52 }
 0x453   :  { %v2118_v58 = vadd.f32 -2.2, %v749_v53  ;;  %v1772_v52 = vld [vmem:[%s2456_s1 + $0x178] sm:$0xff]  }
 0x454   :  { %466 = vrot.lane.b32.xlu1 %v463_v60, %s1830_s16  ;;  %464 = vrot.lane.b32.xlu0 %v462_v61, %s1830_s16  ;;  %v471_v15 = vmul.f32 %v463_v60, %v2016_v13  ;;  %v470_v16 = vmul.f32 %v462_v61, %v2013_v12  ;;  %v392_v12 = vmul.f32 %v1814_v24, %v1988_v57  ;;  %v2120_v59 = vadd.f32 -2.2, %v750_v54  ;;  %v1773_v53 = vld [vmem:[%s2456_s1 + $0x138] sm:$0xff]   ;;  %v1774_v54 = vld [vmem:[%s2456_s1 + $0x1c8] sm:$0xff]  }
 0x455   :  { %v2122_v60 = vadd.f32 -2.2, %v751_v55 }
 0x456   :  { %v482_v13 = vpack.c.bf16 %v392_v12, %v392_v12 }
 0x4c6   :  { %v467_v5 = vpop.permute.xlu1 %466  ;;  %v465_v10 = vpop.permute.xlu0 %464 }
 0x4c7   :  { %v468_v11 = vsel %vm119_vm13, %v465_v10, %v467_v5  ;;  %v469_v14 = vsel %vm119_vm13, %v467_v5, %v465_v10 }
 0x4c8   :  { %v474_v26 = vmul.f32 %v472_v6, %v468_v11  ;;  %v475_v27 = vmul.f32 %v473_v9, %v469_v14 }
 0x4ca   :  { %v476_v17 = vadd.f32 %v474_v26, %v470_v16  ;;  %v477_v18 = vadd.f32 %v475_v27, %v471_v15 }
 0x4cc   :  { %v478_v19 = vmul.f32 0.8333333, %v476_v17  ;;  %v479_v20 = vmul.f32 0.8333333, %v477_v18 }
 0x4ce   :  { %v480_v21 = vpack.c.bf16 %v478_v19, %v478_v19  ;;  %v481_v22 = vpack.c.bf16 %v479_v20, %v479_v20 }
 0x4d0   :  { %620 = vmatprep.mubr.bf16.mxu1 %v481_v22 }
 0x4d1   :  { %621 = vmatmul.mubr.bf16.vlgmr.msra.gmra.mrb[4].mxu1 %v480_v21 }
 0x4d2   :  { %1686 = vmatpush3.bf16.msra.mxu1 %v1754_v23  ;;  %1687 = vmatprep.mubr.msk.bf16.mxu1 %vm1831_vm14, %v1827_v1 }
 0x4d9   :  { %1688 = vmatmul.mubr.msk.bf16.vlgmr.msra.gmra.mrb[8].mxu1 %vm76_vm0, %v482_v13 }
 0x5a4   :  { %v1627_v25 = vpop.f32.mrb[4].mxu1 }
 0x5a5   :  { %v1628_v28 = vpop.f32.mrb[5].mxu1 }
 0x5a6   :  { %v1629_v29 = vadd.f32 %v1628_v28, %v1627_v25  ;;  %v1630_v30 = vpop.f32.mrb[6].mxu1 }
 0x5a7   :  { %v1631_v33 = vpop.f32.mrb[7].mxu1 }
 0x5ac   :  { %v662_v34 = vpop.f32.mrb[8].mxu1 }
 0x5ad   :  { %v663_v35 = vadd.f32 %v1629_v29, %v662_v34  ;;  %v1689_v0 = vpop.f32.mrb[9].mxu1  ;;  %v1755_v34 = vld [vmem:[%s2456_s1 + $0x190] sm:$0xff]  }
 0x5ae   :  { %v665_v36 = vpop.f32.mrb[10].mxu1  ;;  %v1832_v0 = vmov 0  }
 0x5af   :  { %v720_v37 = vsub.f32 0.0, %v663_v35  ;;  %v1690_v38 = vpop.f32.mrb[11].mxu1  ;;  %731 = vrot.lane.b32.xlu1 %v663_v35, %s1826_s14  ;;  %728 = vrot.lane.b32.xlu0 %v663_v35, %s1825_s13  ;;  %v1758_v36 = vld [vmem:[%s2456_s1 + $0x110] sm:$0xff]  }
 0x5b0   :  { %1046 = vmatprep.subr.bf16.mxu0 %v1832_v0  ;;  %v1756_v38 = vld [vmem:[%s2456_s1 + $0x198] sm:$0xff]  }
 0x5b1   :  { %v721_v39 = vmul.f32 1.442695, %v720_v37  ;;  %v1760_v37 = vld [vmem:[%s2456_s1 + $0x158] sm:$0xff]   ;;  %1047 = vmatpush1.bf16.msra.mxu0 %v1755_v34 }
 0x5b2   :  { %1048 = vmatprep.subr.bf16.mxu0 %v1832_v0 }
 0x5b3   :  { %1815 = vpow2.f32 %v721_v39  ;;  %734 = vrot.lane.b32.xlu0 %v663_v35, %s1829_s15  ;;  %v1761_v39 = vld [vmem:[%s2456_s1 + $0x118] sm:$0xff]  }
 0x5b5   :  { %1049 = vmatpush1.bf16.msra.mxu0 %v1756_v38 }
 0x5b6   :  { %1050 = vmatprep.subr.bf16.mxu0 %v1832_v0 }
 0x5bd   :  { %v1816_v57 = vpop.eup %1815 }
 0x5be   :  { %v723_v40 = vadd.f32 1.0, %v1816_v57  ;;  %v1763_v57 = vld [vmem:[%s2456_s1 + $0x160] sm:$0xff]  }
 0x5c0   :  { %1817 = vrcp.f32 %v723_v40  ;;  %v1759_v40 = vld [vmem:[%s2456_s1 + $0x1a0] sm:$0xff]  }
 0x5c1   :  { %1051 = vmatpush1.bf16.msra.mxu0 %v1759_v40 }
 0x5c2   :  { %1052 = vmatprep.subr.bf16.mxu0 %v1832_v0 }
 0x5ca   :  { %v1818_v41 = vpop.eup %1817 }
 0x5cb   :  { %v726_v42 = vmul.f32 %v1818_v41, %v663_v35  ;;  %v1764_v41 = vld [vmem:[%s2456_s1 + $0x120] sm:$0xff]  }
 0x5cd   :  { %v846_v43 = vpack.c.bf16 %v726_v42, %v726_v42  ;;  %v1766_v42 = vld [vmem:[%s2456_s1 + $0x168] sm:$0xff]  }
 0x5cf   :  { %1559 = vmatprep.mubr.msk.bf16.mxu0 %vm78_vm1, %v846_v43  ;;  %v1762_v43 = vld [vmem:[%s2456_s1 + $0x1a8] sm:$0xff]  }
 0x5d0   :  { %1053 = vmatpush1.bf16.msra.mxu0 %v1762_v43 }
 0x5d1   :  { %1054 = vmatprep.subr.bf16.mxu0 %v1832_v0 }
 0x5d4   :  { %1055 = vmatpush1.bf16.msra.mxu0 %v1765_v46 }
 0x5d5   :  { %1056 = vmatprep.subr.bf16.mxu0 %v1832_v0 }
 0x5d8   :  { %1057 = vmatpush1.bf16.msra.mxu0 %v1768_v48 }
 0x5d9   :  { %1058 = vmatprep.subr.bf16.mxu0 %v1832_v0 }
 0x5dc   :  { %1059 = vmatpush1.bf16.msra.mxu0 %v1771_v49 }
 0x5dd   :  { %1060 = vmatprep.subr.bf16.mxu0 %v1832_v0 }
 0x5e0   :  { %1061 = vmatpush1.bf16.msra.mxu0 %v1774_v54 }
 0x5e1   :  { %1062 = vmatprep.subr.bf16.mxu0 %v1832_v0 }
 0x621   :  { %v729_v31 = vpop.permute.xlu0 %728  ;;  %v732_v56 = vpop.permute.xlu1 %731 }
 0x622   :  { %v737_v32 = vsel %vm78_vm1, %v663_v35, %v729_v31  ;;  %v1757_v35 = vld [vmem:[%s2456_s1 + $0x150] sm:$0xff]  }
 0x623   :  { %v738_v7 = vsel %vm82_vm3, %v737_v32, %v732_v56  ;;  %1635 = vmatprep.subr.bf16.mxu1 %v1757_v35 }
 0x624   :  { %1636 = vmatpush3.bf16.msra.mxu1 %v1758_v36 }
 0x625   :  { %v735_v8 = vpop.permute.xlu0 %734  ;;  %1637 = vmatprep.subr.bf16.mxu1 %v1760_v37 }
 0x626   :  { %v739_v61 = vsel %vm86_vm5, %v738_v7, %v735_v8 }
 0x627   :  { %v2127_v62 = vsub.f32 %v739_v61, %v2118_v58  ;;  %v2130_v63 = vsub.f32 %v739_v61, %v2120_v59  ;;  %v2133_v2 = vsub.f32 %v739_v61, %v2122_v60 }
 0x628   :  { %1638 = vmatpush3.bf16.msra.mxu1 %v1761_v39 }
 0x629   :  { %vm760_vm6 = vcmp.ge.f32.partialorder %v2133_v2, 0.0  ;;  %vm763_vm10 = vcmp.lt.f32.partialorder %v2133_v2, 0.4  ;;  %vm758_vm11 = vcmp.ge.f32.partialorder %v2127_v62, 0.0  ;;  %vm759_vm12 = vcmp.ge.f32.partialorder %v2130_v63, 0.0  ;;  %1639 = vmatprep.subr.bf16.mxu1 %v1763_v57 }
 0x62a   :  { %vm766_vm13 = vmand %vm760_vm6, %vm763_vm10  ;;  %vm761_vm14 = vcmp.lt.f32.partialorder %v2127_v62, 0.4  ;;  %vm762_vm15 = vcmp.lt.f32.partialorder %v2130_v63, 0.4  ;;  %v784_v16 = vsub.f32 0.8, %v2130_v63 }
 0x62b   :  { %v769_v4 = vsel %vm766_vm13, 1.0, %v1827_v1  ;;  %vm764_vm2 = vmand %vm758_vm11, %vm761_vm14  ;;  %v783_v26 = vsub.f32 0.8, %v2127_v62  ;;  %v785_v27 = vsub.f32 0.8, %v2133_v2  ;;  %vm1488_vm13 = vcmp.ge.s32.totalorder %v1868_v3, 8 }
 0x62c   :  { %774 = vrot.lane.b32.xlu0 %v769_v4, %s1829_s15  ;;  %vm765_vm7 = vmand %vm759_vm12, %vm762_vm15  ;;  %v767_v5 = vsel %vm764_vm2, 1.0, %v1827_v1  ;;  %v782_v12 = vmul.f32 %v769_v4, %v2133_v2  ;;  %1640 = vmatpush3.bf16.msra.mxu1 %v1764_v41  ;;  %v807_v31 = vsub.f32 1.2, %v2127_v62  ;;  %v808_v56 = vsub.f32 1.2, %v2130_v63 }
 0x62d   :  { %v768_v6 = vsel %vm765_vm7, 1.0, %v1827_v1  ;;  %v780_v17 = vmul.f32 %v767_v5, %v2127_v62  ;;  %1641 = vmatprep.subr.bf16.mxu1 %v1766_v42  ;;  %v809_v32 = vsub.f32 1.2, %v2133_v2  ;;  %v833_v34 = vsub.f32 1.6, %v2133_v2 }
 0x62e   :  { %v1711_v9 = vpack.i.bf16 %v768_v6, %v767_v5  ;;  %v781_v21 = vmul.f32 %v768_v6, %v2130_v63  ;;  %v1775_v5 = vld [vmem:[%s2456_s1 + $0x180] sm:$0xff]  }
 0x630   :  { %1712 = vrot.lane.b32.xlu1 %v1711_v9, %s1829_s15  ;;  %1642 = vmatpush3.bf16.msra.mxu1 %v1767_v44 }
 0x631   :  { %1643 = vmatprep.subr.bf16.mxu1 %v1769_v45 }
 0x634   :  { %1644 = vmatpush3.bf16.msra.mxu1 %v1770_v47 }
 0x635   :  { %1645 = vmatprep.subr.bf16.mxu1 %v1772_v52 }
 0x638   :  { %1646 = vmatpush3.bf16.msra.mxu1 %v1773_v53 }
 0x639   :  { %1647 = vmatprep.subr.bf16.mxu1 %v1775_v5 }
 0x69e   :  { %v775_v15 = vpop.permute.xlu0 %774 }
 0x6a2   :  { %v1713_v10 = vpop.permute.xlu1 %1712 }
 0x6a3   :  { %v1715_v11 = vunpack.i.h.bf16 %v1713_v10  ;;  %v1714_v14 = vunpack.i.l.bf16 %v1713_v10 }
 0x6a5   :  { %v777_v18 = vsel %vm776_vm8, %v1715_v11, %v775_v15  ;;  %v778_v19 = vsel %vm776_vm8, %v1714_v14, %v1715_v11  ;;  %v779_v20 = vsel %vm776_vm8, %v775_v15, %v1714_v14  ;;  %v1776_v14 = vld [vmem:[%s2456_s1 + $0x140] sm:$0xff]   ;;  %v1777_v15 = vld [vmem:[%s2456_s1 + $0x1d0] sm:$0xff]  }
 0x6a6   :  { %v787_v22 = vmul.f32 %v784_v16, %v777_v18  ;;  %v786_v23 = vmul.f32 %v783_v26, %v778_v19  ;;  %v788_v24 = vmul.f32 %v785_v27, %v779_v20  ;;  %1648 = vmatpush3.bf16.msra.mxu1 %v1776_v14  ;;  %1063 = vmatpush1.bf16.msra.mxu0 %v1777_v15 }
 0x6a7   :  { %1064 = vmatprep.subr.bf16.mxu0 %v1832_v0 }
 0x6a8   :  { %v790_v13 = vadd.f32 %v787_v22, %v781_v21  ;;  %v789_v25 = vadd.f32 %v786_v23, %v780_v17  ;;  %v791_v30 = vadd.f32 %v788_v24, %v782_v12  ;;  %v1778_v17 = vld [vmem:[%s2456_s1 + $0x188] sm:$0xff]   ;;  %v1780_v22 = vld [vmem:[%s2456_s1 + $0x1d8] sm:$0xff]   ;;  %v832_v12 = vsub.f32 1.6, %v2130_v63 }
 0x6a9   :  { %v1779_v21 = vld [vmem:[%s2456_s1 + $0x148] sm:$0xff]   ;;  %1649 = vmatprep.subr.bf16.mxu1 %v1778_v17 }
 0x6aa   :  { %v2159_v28 = vmul.f32 2.5, %v790_v13  ;;  %v2161_v29 = vmul.f32 2.5, %v789_v25  ;;  %v2167_v33 = vmul.f32 2.5, %v791_v30  ;;  %1650 = vmatpush3.bf16.msra.mxu1 %v1779_v21  ;;  %1065 = vmatpush1.bf16.msra.mxu0 %v1780_v22 }
 0x6ab   :  { %1448 = vmatprep.subr.bf16.mxu0 %v1832_v0 }
 0x6ac   :  { %797 = vrot.lane.b32.xlu0 %v2159_v28, %s1829_s15  ;;  %795 = vrot.lane.b32.xlu1 %v2161_v29, %s1829_s15  ;;  %v805_v8 = vmul.f32 %v2159_v28, %v2130_v63  ;;  %v806_v6 = vmul.f32 %v2167_v33, %v2133_v2  ;;  %v804_v16 = vmul.f32 %v2161_v29, %v2127_v62 }
 0x6b0   :  { %799 = vrot.lane.b32.xlu1 %v2167_v33, %s1829_s15  ;;  %v831_v33 = vsub.f32 1.6, %v2127_v62 }
 0x71e   :  { %v798_v50 = vpop.permute.xlu0 %797  ;;  %v796_v51 = vpop.permute.xlu1 %795 }
 0x71f   :  { %v802_v55 = vsel %vm776_vm8, %v796_v51, %v798_v50 }
 0x720   :  { %v810_v9 = vmul.f32 %v807_v31, %v802_v55 }
 0x722   :  { %v800_v7 = vpop.permute.xlu1 %799  ;;  %v813_v20 = vadd.f32 %v810_v9, %v804_v16 }
 0x723   :  { %v801_v61 = vsel %vm776_vm8, %v798_v50, %v800_v7  ;;  %v803_v4 = vsel %vm776_vm8, %v800_v7, %v796_v51 }
 0x724   :  { %v811_v10 = vmul.f32 %v808_v56, %v801_v61  ;;  %v812_v11 = vmul.f32 %v809_v32, %v803_v4  ;;  %v816_v23 = vmul.f32 1.25, %v813_v20 }
 0x726   :  { %v815_v26 = vadd.f32 %v812_v11, %v806_v6  ;;  %v814_v27 = vadd.f32 %v811_v10, %v805_v8  ;;  %v828_v36 = vmul.f32 %v816_v23, %v2127_v62 }
 0x728   :  { %v818_v18 = vmul.f32 1.25, %v815_v26  ;;  %v817_v19 = vmul.f32 1.25, %v814_v27 }
 0x72a   :  { %823 = vrot.lane.b32.xlu1 %v818_v18, %s1829_s15  ;;  %821 = vrot.lane.b32.xlu0 %v817_v19, %s1829_s15  ;;  %v829_v28 = vmul.f32 %v817_v19, %v2130_v63  ;;  %v830_v39 = vmul.f32 %v818_v18, %v2133_v2 }
 0x72e   :  { %819 = vrot.lane.b32.xlu0 %v816_v23, %s1829_s15 }
 0x79c   :  { %v824_v24 = vpop.permute.xlu1 %823  ;;  %v822_v13 = vpop.permute.xlu0 %821 }
 0x79d   :  { %v825_v25 = vsel %vm776_vm8, %v822_v13, %v824_v24 }
 0x79e   :  { %v835_v29 = vmul.f32 %v832_v12, %v825_v25 }
 0x7a0   :  { %v838_v30 = vadd.f32 %v835_v29, %v829_v28  ;;  %v820_v35 = vpop.permute.xlu0 %819 }
 0x7a1   :  { %v826_v37 = vsel %vm776_vm8, %v820_v35, %v822_v13  ;;  %v827_v38 = vsel %vm776_vm8, %v824_v24, %v820_v35 }
 0x7a2   :  { %v834_v57 = vmul.f32 %v831_v33, %v826_v37  ;;  %v836_v40 = vmul.f32 %v833_v34, %v827_v38  ;;  %v841_v63 = vmul.f32 0.8333333, %v838_v30 }
 0x7a4   :  { %v837_v41 = vadd.f32 %v834_v57, %v828_v36  ;;  %v839_v42 = vadd.f32 %v836_v40, %v830_v39  ;;  %v844_v43 = vpack.c.bf16 %v841_v63, %v841_v63  ;;  %v1781_v57 = vld [vmem:[%s2456_s1 + $0x260] sm:$0xff]  }
 0x7a5   :  { %v1783_v40 = vld [vmem:[%s2456_s1 + $0x220] sm:$0xff]  }
 0x7a6   :  { %v840_v44 = vmul.f32 0.8333333, %v837_v41  ;;  %v842_v45 = vmul.f32 0.8333333, %v839_v42  ;;  %1038 = vmatprep.mubr.bf16.mxu1 %v844_v43  ;;  %v1784_v63 = vld [vmem:[%s2456_s1 + $0x1e0] sm:$0xff]   ;;  %v1786_v41 = vld [vmem:[%s2456_s1 + $0x228] sm:$0xff]   ;;  %1657 = vmatprep.subr.bf16.mxu1 %v1783_v40 }
 0x7a7   :  { %v1782_v42 = vld [vmem:[%s2456_s1 + $0x268] sm:$0xff]  }
 0x7a8   :  { %v843_v46 = vpack.c.bf16 %v840_v44, %v840_v44  ;;  %v845_v47 = vpack.c.bf16 %v842_v45, %v842_v45  ;;  %v1787_v43 = vld [vmem:[%s2456_s1 + $0x1e8] sm:$0xff]   ;;  %v1789_v44 = vld [vmem:[%s2456_s1 + $0x230] sm:$0xff]  }
 0x7a9   :  { %v1785_v45 = vld [vmem:[%s2456_s1 + $0x270] sm:$0xff]  }
 0x7aa   :  { %1039 = vmatmul.mubr.bf16.vlgmr.msra.gmra.mrb[12].mxu1 %v843_v46  ;;  %1079 = vmatmul.mubr.bf16.vlgmr.msra.gmra.mrb[4].mxu0 %v845_v47  ;;  %v1790_v46 = vld [vmem:[%s2456_s1 + $0x1f0] sm:$0xff]   ;;  %v1792_v47 = vld [vmem:[%s2456_s1 + $0x238] sm:$0xff]  }
 0x7ab   :  { %1449 = vmatpush1.bf16.msra.mxu0 %v1781_v57  ;;  %1658 = vmatpush3.bf16.msra.mxu1 %v1784_v63 }
 0x7ac   :  { %1450 = vmatprep.subr.bf16.mxu0 %v1832_v0  ;;  %1659 = vmatprep.subr.bf16.mxu1 %v1786_v41 }
 0x7af   :  { %1451 = vmatpush1.bf16.msra.mxu0 %v1782_v42  ;;  %1660 = vmatpush3.bf16.msra.mxu1 %v1787_v43 }
 0x7b0   :  { %1452 = vmatprep.subr.bf16.mxu0 %v1832_v0  ;;  %1661 = vmatprep.subr.bf16.mxu1 %v1789_v44 }
 0x7b3   :  { %1453 = vmatpush1.bf16.msra.mxu0 %v1785_v45  ;;  %1662 = vmatpush3.bf16.msra.mxu1 %v1790_v46 }
 0x7b4   :  { %1454 = vmatprep.subr.bf16.mxu0 %v1832_v0  ;;  %1663 = vmatprep.subr.bf16.mxu1 %v1792_v47 }
 0x87d   :  { %v1651_v62 = vpop.f32.mrb[12].mxu1  ;;  %v1080_v48 = vpop.f32.mrb[4].mxu0 }
 0x87e   :  { %v1652_v49 = vpop.f32.mrb[13].mxu1  ;;  %v1082_v50 = vpop.f32.mrb[5].mxu0 }
 0x87f   :  { %v1653_v51 = vadd.f32 %v1652_v49, %v1651_v62  ;;  %v1654_v52 = vpop.f32.mrb[14].mxu1  ;;  %v1083_v2 = vpop.f32.mrb[6].mxu0  ;;  %v1788_v62 = vld [vmem:[%s2456_s1 + $0x278] sm:$0xff]   ;;  %v1795_v49 = vld [vmem:[%s2456_s1 + $0x240] sm:$0xff]  }
 0x880   :  { %v1655_v53 = vpop.f32.mrb[15].mxu1  ;;  %v1084_v54 = vpop.f32.mrb[7].mxu0  ;;  %1455 = vmatpush1.bf16.msra.mxu0 %v1788_v62  ;;  %v1791_v50 = vld [vmem:[%s2456_s1 + $0x280] sm:$0xff]   ;;  %v1794_v52 = vld [vmem:[%s2456_s1 + $0x288] sm:$0xff]   ;;  %v1797_v2 = vld [vmem:[%s2456_s1 + $0x290] sm:$0xff]  }
 0x881   :  { %v1081_v55 = vadd.f32 %v1653_v51, %v1080_v48  ;;  %v1793_v48 = vld [vmem:[%s2456_s1 + $0x1f8] sm:$0xff]   ;;  %1456 = vmatprep.subr.bf16.mxu0 %v1832_v0  ;;  %v1796_v51 = vld [vmem:[%s2456_s1 + $0x200] sm:$0xff]  }
 0x882   :  { %1664 = vmatpush3.bf16.msra.mxu1 %v1793_v48 }
 0x883   :  { %v1138_v31 = vsub.f32 0.0, %v1081_v55  ;;  %1149 = vrot.lane.b32.xlu0 %v1081_v55, %s1826_s14  ;;  %1146 = vrot.lane.b32.xlu1 %v1081_v55, %s1825_s13 }
 0x884   :  { %1665 = vmatprep.subr.bf16.mxu1 %v1795_v49  ;;  %1457 = vmatpush1.bf16.msra.mxu0 %v1791_v50 }
 0x885   :  { %v1139_v56 = vmul.f32 1.442695, %v1138_v31  ;;  %1458 = vmatprep.subr.bf16.mxu0 %v1832_v0  ;;  %v1799_v31 = vld [vmem:[%s2456_s1 + $0x208] sm:$0xff]  }
 0x886   :  { %1666 = vmatpush3.bf16.msra.mxu1 %v1796_v51 }
 0x887   :  { %1819 = vpow2.f32 %v1139_v56  ;;  %1152 = vrot.lane.b32.xlu1 %v1081_v55, %s1829_s15  ;;  %v1800_v56 = vld [vmem:[%s2456_s1 + $0x298] sm:$0xff]  }
 0x888   :  { %1459 = vmatpush1.bf16.msra.mxu0 %v1794_v52 }
 0x889   :  { %1460 = vmatprep.subr.bf16.mxu0 %v1832_v0 }
 0x88c   :  { %1461 = vmatpush1.bf16.msra.mxu0 %v1797_v2 }
 0x88d   :  { %1462 = vmatprep.subr.bf16.mxu0 %v1832_v0 }
 0x890   :  { %1463 = vmatpush1.bf16.msra.mxu0 %v1800_v56 }
 0x891   :  { %v1820_v32 = vpop.eup %1819  ;;  %1464 = vmatprep.subr.bf16.mxu0 %v1832_v0 }
 0x892   :  { %v1141_v7 = vadd.f32 1.0, %v1820_v32 }
 0x894   :  { %1821 = vrcp.f32 %v1141_v7 }
 0x89e   :  { %v1822_v8 = vpop.eup %1821 }
 0x89f   :  { %v1144_v61 = vmul.f32 %v1822_v8, %v1081_v55 }
 0x8a1   :  { %v1248_v4 = vpack.c.bf16 %v1144_v61, %v1144_v61 }
 0x8a3   :  { %1586 = vmatprep.mubr.msk.bf16.mxu0 %vm78_vm1, %v1248_v4 }
 0x8f5   :  { %v1147_v5 = vpop.permute.xlu1 %1146  ;;  %v1150_v6 = vpop.permute.xlu0 %1149 }
 0x8f6   :  { %v1155_v9 = vsel %vm78_vm1, %v1081_v55, %v1147_v5  ;;  %v1798_v55 = vld [vmem:[%s2456_s1 + $0x248] sm:$0xff]  }
 0x8f7   :  { %v1156_v10 = vsel %vm82_vm3, %v1155_v9, %v1150_v6  ;;  %1667 = vmatprep.subr.bf16.mxu1 %v1798_v55 }
 0x8f8   :  { %1668 = vmatpush3.bf16.msra.mxu1 %v1799_v31 }
 0x8f9   :  { %v1153_v11 = vpop.permute.xlu1 %1152 }
 0x8fa   :  { %v1157_v14 = vsel %vm86_vm5, %v1156_v10, %v1153_v11  ;;  %v1801_v10 = vld [vmem:[%s2456_s1 + $0x250] sm:$0xff]  }
 0x8fb   :  { %v2298_v15 = vsub.f32 %v1157_v14, %v2118_v58  ;;  %v2301_v16 = vsub.f32 %v1157_v14, %v2120_v59  ;;  %v2304_v26 = vsub.f32 %v1157_v14, %v2122_v60  ;;  %1669 = vmatprep.subr.bf16.mxu1 %v1801_v10 }
 0x8fd   :  { %vm1163_vm4 = vcmp.ge.f32.partialorder %v2304_v26, 0.0  ;;  %vm1166_vm9 = vcmp.lt.f32.partialorder %v2304_v26, 0.4  ;;  %vm1161_vm1 = vcmp.ge.f32.partialorder %v2298_v15, 0.0  ;;  %vm1162_vm3 = vcmp.ge.f32.partialorder %v2301_v16, 0.0 }
 0x8fe   :  { %vm1169_vm6 = vmand %vm1163_vm4, %vm1166_vm9  ;;  %vm1164_vm5 = vcmp.lt.f32.partialorder %v2298_v15, 0.4  ;;  %vm1165_vm10 = vcmp.lt.f32.partialorder %v2301_v16, 0.4  ;;  %v1186_v21 = vsub.f32 0.8, %v2301_v16 }
 0x8ff   :  { %v1172_v58 = vsel %vm1169_vm6, 1.0, %v1827_v1  ;;  %vm1167_vm11 = vmand %vm1161_vm1, %vm1164_vm5  ;;  %v1185_v22 = vsub.f32 0.8, %v2298_v15  ;;  %v1187_v23 = vsub.f32 0.8, %v2304_v26 }
 0x900   :  { %1177 = vrot.lane.b32.xlu1 %v1172_v58, %s1829_s15  ;;  %vm1168_vm12 = vmand %vm1162_vm3, %vm1165_vm10  ;;  %v1170_v59 = vsel %vm1167_vm11, 1.0, %v1827_v1  ;;  %v1184_v33 = vmul.f32 %v1172_v58, %v2304_v26  ;;  %v1209_v7 = vsub.f32 1.2, %v2298_v15  ;;  %v1210_v8 = vsub.f32 1.2, %v2301_v16 }
 0x901   :  { %v1171_v60 = vsel %vm1168_vm12, 1.0, %v1827_v1  ;;  %v1182_v24 = vmul.f32 %v1170_v59, %v2298_v15  ;;  %v1211_v61 = vsub.f32 1.2, %v2304_v26 }
 0x902   :  { %v1716_v27 = vpack.i.bf16 %v1171_v60, %v1170_v59  ;;  %v1183_v25 = vmul.f32 %v1171_v60, %v2301_v16  ;;  %v1802_v60 = vld [vmem:[%s2456_s1 + $0x210] sm:$0xff]  }
 0x903   :  { %1670 = vmatpush3.bf16.msra.mxu1 %v1802_v60 }
 0x904   :  { %1717 = vrot.lane.b32.xlu0 %v1716_v27, %s1829_s15  ;;  %v1803_v27 = vld [vmem:[%s2456_s1 + $0x2a0] sm:$0xff]  }
 0x905   :  { %1465 = vmatpush1.bf16.msra.mxu0 %v1803_v27 }
 0x906   :  { %1466 = vmatprep.subr.bf16.mxu0 %v1832_v0 }
 0x972   :  { %v1178_v20 = vpop.permute.xlu1 %1177 }
 0x976   :  { %v1718_v17 = vpop.permute.xlu0 %1717 }
 0x977   :  { %v1720_v18 = vunpack.i.h.bf16 %v1718_v17  ;;  %v1719_v19 = vunpack.i.l.bf16 %v1718_v17 }
 0x979   :  { %v1179_v12 = vsel %vm776_vm8, %v1720_v18, %v1178_v20  ;;  %v1180_v1 = vsel %vm776_vm8, %v1719_v19, %v1720_v18  ;;  %v1181_v13 = vsel %vm776_vm8, %v1178_v20, %v1719_v19  ;;  %v1804_v20 = vld [vmem:[%s2456_s1 + $0x258] sm:$0xff]  }
 0x97a   :  { %v1189_v28 = vmul.f32 %v1186_v21, %v1179_v12  ;;  %v1188_v29 = vmul.f32 %v1185_v22, %v1180_v1  ;;  %v1190_v30 = vmul.f32 %v1187_v23, %v1181_v13  ;;  %v1806_v12 = vld [vmem:[%s2456_s1 + $0x2a8] sm:$0xff]   ;;  %1671 = vmatprep.subr.bf16.mxu1 %v1804_v20  ;;  %v1234_v13 = vsub.f32 1.6, %v2301_v16 }
 0x97b   :  { %1467 = vmatpush1.bf16.msra.mxu0 %v1806_v12 }
 0x97c   :  { %v1192_v34 = vadd.f32 %v1189_v28, %v1183_v25  ;;  %v1191_v35 = vadd.f32 %v1188_v29, %v1182_v24  ;;  %v1193_v38 = vadd.f32 %v1190_v30, %v1184_v33  ;;  %v1805_v24 = vld [vmem:[%s2456_s1 + $0x218] sm:$0xff]  }
 0x97d   :  { %1672 = vmatpush3.bf16.msra.mxu1 %v1805_v24 }
 0x97e   :  { %v1195_v36 = vmul.f32 2.5, %v1192_v34  ;;  %v2329_v37 = vmul.f32 2.5, %v1191_v35  ;;  %v1196_v39 = vmul.f32 2.5, %v1193_v38  ;;  %v1233_v34 = vsub.f32 1.6, %v2298_v15 }
 0x97f   :  { %v1235_v35 = vsub.f32 1.6, %v2304_v26 }
 0x980   :  { %1199 = vrot.lane.b32.xlu1 %v1195_v36, %s1829_s15  ;;  %1197 = vrot.lane.b32.xlu0 %v2329_v37, %s1829_s15  ;;  %v1207_v5 = vmul.f32 %v1195_v36, %v2301_v16  ;;  %v1208_v11 = vmul.f32 %v1196_v39, %v2304_v26  ;;  %v1206_v17 = vmul.f32 %v2329_v37, %v2298_v15 }
 0x984   :  { %1201 = vrot.lane.b32.xlu0 %v1196_v39, %s1829_s15 }
 0x9f2   :  { %v1200_v53 = vpop.permute.xlu1 %1199  ;;  %v1198_v54 = vpop.permute.xlu0 %1197 }
 0x9f3   :  { %v1204_v32 = vsel %vm776_vm8, %v1198_v54, %v1200_v53 }
 0x9f4   :  { %v1212_v14 = vmul.f32 %v1209_v7, %v1204_v32 }
 0x9f6   :  { %v1202_v4 = vpop.permute.xlu0 %1201  ;;  %v1215_v23 = vadd.f32 %v1212_v14, %v1206_v17 }
 0x9f7   :  { %v1203_v6 = vsel %vm776_vm8, %v1200_v53, %v1202_v4  ;;  %v1205_v9 = vsel %vm776_vm8, %v1202_v4, %v1198_v54 }
 0x9f8   :  { %v1213_v58 = vmul.f32 %v1210_v8, %v1203_v6  ;;  %v1214_v59 = vmul.f32 %v1211_v61, %v1205_v9  ;;  %v1218_v1 = vmul.f32 1.25, %v1215_v23 }
 0x9fa   :  { %v1217_v18 = vadd.f32 %v1214_v59, %v1208_v11  ;;  %v1216_v19 = vadd.f32 %v1213_v58, %v1207_v5  ;;  %v1230_v37 = vmul.f32 %v1218_v1, %v2298_v15 }
 0x9fc   :  { %v1220_v21 = vmul.f32 1.25, %v1217_v18  ;;  %v1219_v22 = vmul.f32 1.25, %v1216_v19 }
 0x9fe   :  { %1225 = vrot.lane.b32.xlu0 %v1220_v21, %s1829_s15  ;;  %1223 = vrot.lane.b32.xlu1 %v1219_v22, %s1829_s15  ;;  %v1231_v29 = vmul.f32 %v1219_v22, %v2301_v16  ;;  %v1232_v57 = vmul.f32 %v1220_v21, %v2304_v26 }
 0xa02   :  { %1221 = vrot.lane.b32.xlu1 %v1218_v1, %s1829_s15 }
 0xa70   :  { %v1226_v0 = vpop.permute.xlu0 %1225  ;;  %v1224_v25 = vpop.permute.xlu1 %1223 }
 0xa71   :  { %v1227_v28 = vsel %vm776_vm8, %v1224_v25, %v1226_v0 }
 0xa72   :  { %v1237_v30 = vmul.f32 %v1234_v13, %v1227_v28 }
 0xa74   :  { %v1240_v33 = vadd.f32 %v1237_v30, %v1231_v29  ;;  %v1222_v36 = vpop.permute.xlu1 %1221 }
 0xa75   :  { %v1228_v38 = vsel %vm776_vm8, %v1222_v36, %v1224_v25  ;;  %v1229_v39 = vsel %vm776_vm8, %v1226_v0, %v1222_v36 }
 0xa76   :  { %v1236_v40 = vmul.f32 %v1233_v34, %v1228_v38  ;;  %v1238_v63 = vmul.f32 %v1235_v35, %v1229_v39  ;;  %v1243_v16 = vmul.f32 0.8333333, %v1240_v33 }
 0xa78   :  { %v1239_v41 = vadd.f32 %v1236_v40, %v1230_v37  ;;  %v1241_v42 = vadd.f32 %v1238_v63, %v1232_v57  ;;  %v1246_v43 = vpack.c.bf16 %v1243_v16, %v1243_v16 }
 0xa7a   :  { %v1242_v44 = vmul.f32 0.8333333, %v1239_v41  ;;  %v1244_v45 = vmul.f32 0.8333333, %v1241_v42  ;;  %1440 = vmatprep.mubr.bf16.mxu1 %v1246_v43 }
 0xa7c   :  { %v1245_v46 = vpack.c.bf16 %v1242_v44, %v1242_v44  ;;  %v1247_v47 = vpack.c.bf16 %v1244_v45, %v1244_v45 }
 0xa7e   :  { %1441 = vmatmul.mubr.bf16.vlgmr.msra.gmra.mrb[16].mxu1 %v1245_v46  ;;  %1481 = vmatmul.mubr.bf16.vlgmr.msra.gmra.mrb[8].mxu0 %v1247_v47 }
 0xb51   :  { %v1673_v15 = vpop.f32.mrb[16].mxu1  ;;  %v1482_v62 = vpop.f32.mrb[8].mxu0 }
 0xb52   :  { %v1674_v48 = vpop.f32.mrb[17].mxu1  ;;  %v1484_v49 = vpop.f32.mrb[9].mxu0 }
 0xb53   :  { %v1675_v50 = vadd.f32 %v1674_v48, %v1673_v15  ;;  %v1676_v51 = vpop.f32.mrb[18].mxu1  ;;  %v1485_v26 = vpop.f32.mrb[10].mxu0 }
 0xb54   :  { %v1677_v52 = vpop.f32.mrb[19].mxu1  ;;  %v1486_v2 = vpop.f32.mrb[11].mxu0 }
 0xb55   :  { %v1483_v53 = vadd.f32 %v1675_v50, %v1482_v62 }
 0xb57   :  { %v1489_v54 = vmax.f32 %v1483_v53, -20.0 }
 0xb59   :  { %v1490_v55 = vmin.f32 %v1489_v54, 2.0 }
 0xb5b   :  { %v1491_v31 = vsel %vm1488_vm13, %v1490_v55, %v1483_v53 }
 0xb5c   :  { %1492 = vst.msk [vmem:[%s2457_s2] sm:$0xff] %vm76_vm0, %v1491_v31 }

</bundles_post_ra>
